<compile_context>
chip_gen: v7x
topology: tpu7x:2x2x1
jax: 0.10.0
libtpu: 0.0.40
codegen_flags: <defaults>
</compile_context>

<pallas_src>
import math

import jax
import jax.numpy as jnp
import numpy as np
from jax.experimental import pallas as pl
from jax.experimental.pallas import tpu as pltpu

# ---- static problem sizes implied by the module -----------------------------
C_IN = 116          # Conv2d in_channels
C_OUT = 128         # Conv2d out_channels
H = W = 14          # input spatial (Linear(2048) forces pooled 4x4 -> 128*16=2048)
KH = KW = 5         # AvgPool kernel
SH = SW = 3         # AvgPool stride
OH = OW = 4         # ceil((14-5)/3)+1 = 4 ; every 5x5 window fully inside
P = OH * OW         # 16 pooled positions
S = H * W           # 196 input spatial positions
F_IN = C_OUT * P    # 2048 = Linear in_features
F_OUT = 1024        # Linear out_features

TF = 256            # F_OUT tile streamed per grid step (1 MiB bf16 weight block)
NT = F_OUT // TF    # grid size


def build_pool_matrix_t() -> jnp.ndarray:
    """AvgPool expressed as a [P, S] matrix so the reduction runs on the MXU."""
    pm = np.zeros((P, S), dtype=np.float32)
    for oh in range(OH):
        for ow in range(OW):
            p = oh * OW + ow
            for dh in range(KH):
                for dw in range(KW):
                    pm[p, (oh * SH + dh) * W + (ow * SW + dw)] = 1.0 / (KH * KW)
    return jnp.asarray(pm)


def prepare_params(wc, bc, wl, bl):
    """One-time (init) parameter prep: NOT in the per-call forward path."""
    wc_t = jnp.asarray(wc).reshape(C_OUT, C_IN).T                      # [C_IN, C_OUT]
    bc_row = jnp.asarray(bc).reshape(1, C_OUT)                         # [1, C_OUT]
    # Linear weight: wl[f, k*P + p]  ->  w3[p, k, f]   (then bf16 for HBM/MXU)
    w3 = jnp.asarray(wl).reshape(F_OUT, C_OUT, P).transpose(2, 1, 0)   # [P, C_OUT, F_OUT]
    w3 = w3.astype(jnp.bfloat16)
    bl_row = jnp.asarray(bl).reshape(1, F_OUT)                         # [1, F_OUT]
    pmat_t = build_pool_matrix_t()                                     # [P, S]
    return pmat_t, wc_t, bc_row, w3, bl_row


# ---- fused kernel: pool + 1x1 conv + linear (tiled over F_OUT) + softmax ----
def octopus_fused_kernel(x_ref, pmt_ref, wct_ref, bc_ref, w3_ref, bl_ref,
                         out_ref, flat_ref, y_ref):
    # x_ref   : [N, C_IN, S]      (resident, loaded once)
    # pmt_ref : [P, S]            pooling matrix (transposed)
    # wct_ref : [C_IN, C_OUT]     conv weight, transposed
    # bc_ref  : [1, C_OUT]
    # w3_ref  : [P, C_OUT, TF]    bf16 Linear-weight tile for this grid step
    # bl_ref  : [1, TF]
    # out_ref : [N, F_OUT]        (resident output, written at last step)
    # flat_ref: [P, N, C_OUT] f32 scratch (pool+conv activations)
    # y_ref   : [N, F_OUT]    f32 scratch (logits)
    j = pl.program_id(0)
    nt = pl.num_programs(0)
    n_batch = x_ref.shape[0]
    tf = w3_ref.shape[2]

    # --- stage 1 (step 0 only): AvgPool-as-matmul + 1x1 conv, kept in VMEM ---
    @pl.when(j == 0)
    def _():
        for n in range(n_batch):                                  # tiny static batch
            # pooled^T[p, c] = sum_s pmat^T[p, s] * x[n, c, s]   (A @ B^T form)
            pooled_t = jax.lax.dot_general(
                pmt_ref[...], x_ref[n],
                dimension_numbers=(((1,), (1,)), ((), ())),
                preferred_element_type=jnp.float32)               # [P, C_IN]
            conv_t = jnp.dot(pooled_t, wct_ref[...],
                             preferred_element_type=jnp.float32) + bc_ref[...]
            flat_ref[:, n, :] = conv_t                            # [P, C_OUT] slab

    # --- stage 2 (every step): one F_OUT tile of the Linear layer ------------
    # Flatten+Linear == p-batched matmul over C_OUT, summed over p (weight was
    # pre-permuted host-side), so no in-kernel flatten/reshape is needed.
    f = flat_ref[...].astype(jnp.bfloat16)                        # [P, N, C_OUT]
    y3 = jax.lax.dot_general(
        f, w3_ref[...],
        dimension_numbers=(((2,), (1,)), ((0,), (0,))),           # batch p, contract C_OUT
        preferred_element_type=jnp.float32)                       # [P, N, TF]
    y_tile = jnp.sum(y3, axis=0) + bl_ref[...]                    # [N, TF]
    off = pl.multiple_of(j * tf, tf)
    y_ref[:, pl.ds(off, tf)] = y_tile

    # --- finalize (last step): Dropout is identity (eval); Softmax(dim=1) ----
    # TODO(synk): Dropout(p=0.4) training-mode RNG masking not implemented.
    @pl.when(j == nt - 1)
    def _():
        y = y_ref[...]
        m = jnp.max(y, axis=1, keepdims=True)
        e = jnp.exp(y - m)
        inv = 1.0 / jnp.sum(e, axis=1, keepdims=True)
        out_ref[...] = e * inv


def octopus_aux_forward(x, pmat_t, wc_t, bc_row, w3, bl_row):
    """x: [N, 116, 14, 14] f32  ->  [N, 1024] f32 softmax probabilities."""
    n = x.shape[0]
    x_flat = x.reshape(n, C_IN, S)                 # free NCHW spatial flatten (glue)

    return pl.pallas_call(
        octopus_fused_kernel,
        out_shape=jax.ShapeDtypeStruct((n, F_OUT), jnp.float32),
        grid_spec=pltpu.PrefetchScalarGridSpec(
            num_scalar_prefetch=0,
            grid=(NT,),
            in_specs=[
                pl.BlockSpec((n, C_IN, S), lambda j: (0, 0, 0)),      # x (resident)
                pl.BlockSpec((P, S), lambda j: (0, 0)),               # pool matrix
                pl.BlockSpec((C_IN, C_OUT), lambda j: (0, 0)),        # conv weight^T
                pl.BlockSpec((1, C_OUT), lambda j: (0, 0)),           # conv bias
                pl.BlockSpec((P, C_OUT, TF), lambda j: (0, 0, j)),    # linear weight tile (bf16)
                pl.BlockSpec((1, TF), lambda j: (0, j)),              # linear bias tile
            ],
            out_specs=pl.BlockSpec((n, F_OUT), lambda j: (0, 0)),
            scratch_shapes=[
                pltpu.VMEM((P, n, C_OUT), jnp.float32),               # pool+conv activations
                pltpu.VMEM((n, F_OUT), jnp.float32),                  # logits
            ],
        ),
        compiler_params=pltpu.CompilerParams(
            dimension_semantics=("arbitrary",)),
    )(x_flat, pmat_t, wc_t, bc_row, w3, bl_row)


# ---- plain-JAX reference (for correctness check) ----------------------------
def reference(x, wc, bc, wl, bl):
    pooled = jax.lax.reduce_window(
        x, 0.0, jax.lax.add, (1, 1, KH, KW), (1, 1, SH, SW), "VALID"
    ) / float(KH * KW)
    conv = jnp.einsum("kc,nchw->nkhw", wc.reshape(C_OUT, C_IN), pooled) \
        + bc[None, :, None, None]
    flat = conv.reshape(x.shape[0], -1)
    y = flat @ wl.T + bl
    return jax.nn.softmax(y, axis=1)


if __name__ == "__main__":
    N = 2
    key = jax.random.PRNGKey(0)
    k1, k2, k3, k4, k5 = jax.random.split(key, 5)

    # deterministic synthetic parameters (PyTorch-default-style uniform bounds)
    x = jax.random.normal(k1, (N, C_IN, H, W), jnp.float32)
    bc_bound = 1.0 / math.sqrt(C_IN)          # Conv2d fan_in = 116*1*1
    wc = jax.random.uniform(k2, (C_OUT, C_IN, 1, 1), jnp.float32, -bc_bound, bc_bound)
    bc = jax.random.uniform(k3, (C_OUT,), jnp.float32, -bc_bound, bc_bound)
    bl_bound = 1.0 / math.sqrt(F_IN)          # Linear fan_in = 2048
    wl = jax.random.uniform(k4, (F_OUT, F_IN), jnp.float32, -bl_bound, bl_bound)
    bl = jax.random.uniform(k5, (F_OUT,), jnp.float32, -bl_bound, bl_bound)

    # init-time parameter prep (permuted/transposed/bf16 weights, pool matrix)
    pmat_t, wc_t, bc_row, w3, bl_row = prepare_params(wc, bc, wl, bl)

    fwd = jax.jit(octopus_aux_forward)
    out = jax.block_until_ready(fwd(x, pmat_t, wc_t, bc_row, w3, bl_row))

    ref = jax.block_until_ready(reference(x, wc, bc, wl, bl))
    # bf16 Linear weights => slightly looser tolerance than pure-f32 (softmax is forgiving)
    np.testing.assert_allclose(np.asarray(out), np.asarray(ref), rtol=2e-3, atol=1e-5)
    assert out.shape == (N, F_OUT)
    np.testing.assert_allclose(np.asarray(out).sum(axis=1), np.ones(N), rtol=1e-4, atol=1e-5)

    print("KERNEL_OK")
</pallas_src>

<mosaic_0001>
module attributes {stable_mosaic.version = 11 : i64} {
  func.func @octopus_fused_kernel(%arg0: i32, %arg1: memref<2x116x196xf32, #tpu.memory_space<vmem>>, %arg2: memref<16x196xf32, #tpu.memory_space<vmem>>, %arg3: memref<116x128xf32, #tpu.memory_space<vmem>>, %arg4: memref<1x128xf32, #tpu.memory_space<vmem>>, %arg5: memref<16x128x256xbf16, #tpu.memory_space<vmem>>, %arg6: memref<1x256xf32, #tpu.memory_space<vmem>>, %arg7: memref<2x1024xf32, #tpu.memory_space<vmem>>, %arg8: memref<16x2x128xf32, #tpu.memory_space<vmem>>, %arg9: memref<2x1024xf32, #tpu.memory_space<vmem>>) attributes {dimension_semantics = [#tpu.dimension_semantics<arbitrary>], iteration_bounds = array<i64: 4>, scalar_prefetch = 0 : i64, scratch_operands = 2 : i64, tpu.core_type = #tpu.core_type<tc>, window_params = [{pipeline_mode = #tpu.pipeline_mode<synchronous>, transform_indices = @transform_0, window_bounds = array<i64: 2, 116, 196>}, {pipeline_mode = #tpu.pipeline_mode<synchronous>, transform_indices = @transform_1, window_bounds = array<i64: 16, 196>}, {pipeline_mode = #tpu.pipeline_mode<synchronous>, transform_indices = @transform_2, window_bounds = array<i64: 116, 128>}, {pipeline_mode = #tpu.pipeline_mode<synchronous>, transform_indices = @transform_3, window_bounds = array<i64: 1, 128>}, {transform_indices = @transform_4, window_bounds = array<i64: 16, 128, 256>}, {transform_indices = @transform_5, window_bounds = array<i64: 1, 256>}, {pipeline_mode = #tpu.pipeline_mode<synchronous>, transform_indices = @transform_6, window_bounds = array<i64: 2, 1024>}]} {
    %c0_i32 = arith.constant 0 : i32
    %0 = arith.cmpi eq, %arg0, %c0_i32 : i32
    %1 = arith.extui %0 : i1 to i32
    %c0_i32_0 = arith.constant 0 : i32
    %2 = arith.cmpi ne, %1, %c0_i32_0 : i32
    scf.if %2 {
      %c0_11 = arith.constant 0 : index
      %c0_12 = arith.constant 0 : index
      %18 = vector.load %arg2[%c0_11, %c0_12] : memref<16x196xf32, #tpu.memory_space<vmem>>, vector<16x196xf32>
      %c0_13 = arith.constant 0 : index
      %c0_14 = arith.constant 0 : index
      %c0_15 = arith.constant 0 : index
      %19 = vector.load %arg1[%c0_13, %c0_14, %c0_15] : memref<2x116x196xf32, #tpu.memory_space<vmem>>, vector<1x116x196xf32>
      %20 = vector.shape_cast %19 : vector<1x116x196xf32> to vector<116x196xf32>
      %cst_16 = arith.constant dense<0.000000e+00> : vector<16x116xf32>
      %21 = tpu.matmul %18, %20, %cst_16 {dimension_numbers = #tpu.dot_dimension_numbers<[1], [1], [0], [0], [0, 0, 1, 0], [], []>} : vector<16x196xf32>, vector<116x196xf32>, vector<16x116xf32> -> vector<16x116xf32>
      %c0_17 = arith.constant 0 : index
      %c0_18 = arith.constant 0 : index
      %22 = vector.load %arg3[%c0_17, %c0_18] : memref<116x128xf32, #tpu.memory_space<vmem>>, vector<116x128xf32>
      %cst_19 = arith.constant dense<0.000000e+00> : vector<16x128xf32>
      %23 = tpu.matmul %21, %22, %cst_19 {dimension_numbers = #tpu.dot_dimension_numbers<[1], [0], [0], [1], [0, 0, 1, 1], [], []>} : vector<16x116xf32>, vector<116x128xf32>, vector<16x128xf32> -> vector<16x128xf32>
      %c0_20 = arith.constant 0 : index
      %c0_21 = arith.constant 0 : index
      %24 = vector.load %arg4[%c0_20, %c0_21] : memref<1x128xf32, #tpu.memory_space<vmem>>, vector<1x128xf32>
      %25 = vector.broadcast %24 : vector<1x128xf32> to vector<16x128xf32>
      %26 = arith.addf %23, %25 : vector<16x128xf32>
      %c0_22 = arith.constant 0 : index
      %c0_23 = arith.constant 0 : index
      %c0_24 = arith.constant 0 : index
      %27 = vector.load %arg8[%c0_22, %c0_23, %c0_24] : memref<16x2x128xf32, #tpu.memory_space<vmem>>, vector<16x1x128xf32>
      %28 = vector.shape_cast %27 : vector<16x1x128xf32> to vector<16x128xf32>
      %29 = vector.shape_cast %26 : vector<16x128xf32> to vector<16x1x128xf32>
      tpu.vector_store %arg8[%c0_22, %c0_23, %c0_24], %29 {strides = array<i32>} : memref<16x2x128xf32, #tpu.memory_space<vmem>>, vector<16x1x128xf32>,
      %c0_25 = arith.constant 0 : index
      %c0_26 = arith.constant 0 : index
      %30 = vector.load %arg2[%c0_25, %c0_26] : memref<16x196xf32, #tpu.memory_space<vmem>>, vector<16x196xf32>
      %c1 = arith.constant 1 : index
      %c0_27 = arith.constant 0 : index
      %c0_28 = arith.constant 0 : index
      %31 = vector.load %arg1[%c1, %c0_27, %c0_28] : memref<2x116x196xf32, #tpu.memory_space<vmem>>, vector<1x116x196xf32>
      %32 = vector.shape_cast %31 : vector<1x116x196xf32> to vector<116x196xf32>
      %cst_29 = arith.constant dense<0.000000e+00> : vector<16x116xf32>
      %33 = tpu.matmul %30, %32, %cst_29 {dimension_numbers = #tpu.dot_dimension_numbers<[1], [1], [0], [0], [0, 0, 1, 0], [], []>} : vector<16x196xf32>, vector<116x196xf32>, vector<16x116xf32> -> vector<16x116xf32>
      %c0_30 = arith.constant 0 : index
      %c0_31 = arith.constant 0 : index
      %34 = vector.load %arg3[%c0_30, %c0_31] : memref<116x128xf32, #tpu.memory_space<vmem>>, vector<116x128xf32>
      %cst_32 = arith.constant dense<0.000000e+00> : vector<16x128xf32>
      %35 = tpu.matmul %33, %34, %cst_32 {dimension_numbers = #tpu.dot_dimension_numbers<[1], [0], [0], [1], [0, 0, 1, 1], [], []>} : vector<16x116xf32>, vector<116x128xf32>, vector<16x128xf32> -> vector<16x128xf32>
      %c0_33 = arith.constant 0 : index
      %c0_34 = arith.constant 0 : index
      %36 = vector.load %arg4[%c0_33, %c0_34] : memref<1x128xf32, #tpu.memory_space<vmem>>, vector<1x128xf32>
      %37 = vector.broadcast %36 : vector<1x128xf32> to vector<16x128xf32>
      %38 = arith.addf %35, %37 : vector<16x128xf32>
      %c0_35 = arith.constant 0 : index
      %c1_36 = arith.constant 1 : index
      %c0_37 = arith.constant 0 : index
      %39 = vector.load %arg8[%c0_35, %c1_36, %c0_37] : memref<16x2x128xf32, #tpu.memory_space<vmem>>, vector<16x1x128xf32>
      %40 = vector.shape_cast %39 : vector<16x1x128xf32> to vector<16x128xf32>
      %41 = vector.shape_cast %38 : vector<16x128xf32> to vector<16x1x128xf32>
      tpu.vector_store %arg8[%c0_35, %c1_36, %c0_37], %41 {strides = array<i32>} : memref<16x2x128xf32, #tpu.memory_space<vmem>>, vector<16x1x128xf32>,
    } else {
    }
    %c0 = arith.constant 0 : index
    %c0_1 = arith.constant 0 : index
    %c0_2 = arith.constant 0 : index
    %3 = vector.load %arg8[%c0, %c0_1, %c0_2] : memref<16x2x128xf32, #tpu.memory_space<vmem>>, vector<16x2x128xf32>
    %4 = arith.truncf %3 : vector<16x2x128xf32> to vector<16x2x128xbf16>
    %c0_3 = arith.constant 0 : index
    %c0_4 = arith.constant 0 : index
    %c0_5 = arith.constant 0 : index
    %5 = vector.load %arg5[%c0_3, %c0_4, %c0_5] : memref<16x128x256xbf16, #tpu.memory_space<vmem>>, vector<16x128x256xbf16>
    %cst = arith.constant dense<0.000000e+00> : vector<16x2x256xf32>
    %6 = tpu.matmul %4, %5, %cst {dimension_numbers = #tpu.dot_dimension_numbers<[2], [1], [1], [2], [0, 0, 0, 1, 1, 2], [0], [0]>} : vector<16x2x128xbf16>, vector<16x128x256xbf16>, vector<16x2x256xf32> -> vector<16x2x256xf32>
    %cst_6 = arith.constant dense<0.000000e+00> : vector<2x256xf32>
    %7 = vector.multi_reduction <add>, %6, %cst_6 [0] : vector<16x2x256xf32> to vector<2x256xf32>
    %c0_7 = arith.constant 0 : index
    %c0_8 = arith.constant 0 : index
    %8 = vector.load %arg6[%c0_7, %c0_8] : memref<1x256xf32, #tpu.memory_space<vmem>>, vector<1x256xf32>
    %9 = vector.broadcast %8 : vector<1x256xf32> to vector<2x256xf32>
    %10 = arith.addf %7, %9 : vector<2x256xf32>
    %c256_i32 = arith.constant 256 : i32
    %11 = arith.muli %arg0, %c256_i32 : i32
    %12 = tpu.assume_multiple %11, 256 : i32
    %c0_9 = arith.constant 0 : index
    %13 = arith.index_cast %12 : i32 to index
    %14 = vector.load %arg9[%c0_9, %13] : memref<2x1024xf32, #tpu.memory_space<vmem>>, vector<2x256xf32>
    tpu.vector_store %arg9[%c0_9, %13], %10 {strides = array<i32>} : memref<2x1024xf32, #tpu.memory_space<vmem>>, vector<2x256xf32>,
    %c3_i32 = arith.constant 3 : i32
    %15 = arith.cmpi eq, %arg0, %c3_i32 : i32
    %16 = arith.extui %15 : i1 to i32
    %c0_i32_10 = arith.constant 0 : i32
    %17 = arith.cmpi ne, %16, %c0_i32_10 : i32
    scf.if %17 {
      %c0_11 = arith.constant 0 : index
      %c0_12 = arith.constant 0 : index
      %18 = vector.load %arg9[%c0_11, %c0_12] : memref<2x1024xf32, #tpu.memory_space<vmem>>, vector<2x1024xf32>
      %cst_13 = arith.constant dense<0xFF800000> : vector<2xf32>
      %19 = vector.multi_reduction <maximumf>, %18, %cst_13 [1] : vector<2x1024xf32> to vector<2xf32>
      %20 = vector.shape_cast %19 : vector<2xf32> to vector<2x1xf32>
      %21 = vector.broadcast %20 : vector<2x1xf32> to vector<2x1024xf32>
      %22 = arith.subf %18, %21 : vector<2x1024xf32>
      %23 = math.exp %22 : vector<2x1024xf32>
      %cst_14 = arith.constant dense<0.000000e+00> : vector<2xf32>
      %24 = vector.multi_reduction <add>, %23, %cst_14 [1] : vector<2x1024xf32> to vector<2xf32>
      %25 = vector.shape_cast %24 : vector<2xf32> to vector<2x1xf32>
      %cst_15 = arith.constant 1.000000e+00 : f32
      %26 = vector.broadcast %cst_15 : f32 to vector<2x1xf32>
      %27 = arith.divf %26, %25 : vector<2x1xf32>
      %28 = vector.broadcast %27 : vector<2x1xf32> to vector<2x1024xf32>
      %29 = arith.mulf %23, %28 : vector<2x1024xf32>
      %c0_16 = arith.constant 0 : index
      %c0_17 = arith.constant 0 : index
      %30 = vector.load %arg7[%c0_16, %c0_17] : memref<2x1024xf32, #tpu.memory_space<vmem>>, vector<2x1024xf32>
      tpu.vector_store %arg7[%c0_16, %c0_17], %29 {strides = array<i32>} : memref<2x1024xf32, #tpu.memory_space<vmem>>, vector<2x1024xf32>,
    } else {
    }
    return
  }
  func.func @transform_0(%arg0: i32) -> (i32, i32, i32) {
    %c0_i32 = arith.constant 0 : i32
    %c0_i32_0 = arith.constant 0 : i32
    %c0_i32_1 = arith.constant 0 : i32
    %c0_i32_2 = arith.constant 0 : i32
    return %c0_i32, %c0_i32_0, %c0_i32_1 : i32, i32, i32
  }
  func.func @transform_1(%arg0: i32) -> (i32, i32) {
    %c0_i32 = arith.constant 0 : i32
    %c0_i32_0 = arith.constant 0 : i32
    %c0_i32_1 = arith.constant 0 : i32
    return %c0_i32, %c0_i32_0 : i32, i32
  }
  func.func @transform_2(%arg0: i32) -> (i32, i32) {
    %c0_i32 = arith.constant 0 : i32
    %c0_i32_0 = arith.constant 0 : i32
    %c0_i32_1 = arith.constant 0 : i32
    return %c0_i32, %c0_i32_0 : i32, i32
  }
  func.func @transform_3(%arg0: i32) -> (i32, i32) {
    %c0_i32 = arith.constant 0 : i32
    %c0_i32_0 = arith.constant 0 : i32
    %c0_i32_1 = arith.constant 0 : i32
    return %c0_i32, %c0_i32_0 : i32, i32
  }
  func.func @transform_4(%arg0: i32) -> (i32, i32, i32) {
    %c0_i32 = arith.constant 0 : i32
    %c0_i32_0 = arith.constant 0 : i32
    %c0_i32_1 = arith.constant 0 : i32
    return %c0_i32, %c0_i32_0, %arg0 : i32, i32, i32
  }
  func.func @transform_5(%arg0: i32) -> (i32, i32) {
    %c0_i32 = arith.constant 0 : i32
    %c0_i32_0 = arith.constant 0 : i32
    return %c0_i32, %arg0 : i32, i32
  }
  func.func @transform_6(%arg0: i32) -> (i32, i32) {
    %c0_i32 = arith.constant 0 : i32
    %c0_i32_0 = arith.constant 0 : i32
    %c0_i32_1 = arith.constant 0 : i32
    return %c0_i32, %c0_i32_0 : i32, i32
  }
}

</mosaic_0001>

<bundles_post_ra>
// kernel: octopus_aux_forward.1
= control target key start
LH: loop header
LB: loop body
LE: loop exit
PB: predicated region body
PF: predicated region fallthrough
CT: control target
= control target key end

     0   :  { %s5961_s0 = inlined_call_operand.vmem [shape: f32[2,116,196], index: 0, kind: input, shape index: {}]   ;;  %s5962_s1 = inlined_call_operand.hbm [shape: f32[16,196], index: 1, kind: input, shape index: {}]   ;;  %s5963_s2 = inlined_call_operand.hbm [shape: f32[116,128], index: 2, kind: input, shape index: {}]   ;;  %s5964_s3 = inlined_call_operand.hbm [shape: f32[1,128], index: 3, kind: input, shape index: {}]   ;;  %s5965_s4 = inlined_call_operand.hbm [shape: bf16[16,128,1024], index: 4, kind: input, shape index: {}]   ;;  %s5966_s5 = inlined_call_operand.hbm [shape: f32[1,1024], index: 5, kind: input, shape index: {}]   ;;  %s5967_s6 = inlined_call_operand.hbm [shape: f32[2,1024], index: 6, kind: output, shape index: {}]  }
   0x1   :  { %5979 = sst [smem:[#allocation20_spill]] %s5963_s2 }
   0x2   :  { %5980 = sst [smem:[#allocation21_spill]] %s5965_s4 }
   0x3   :  { %11 = vsyncpa [#allocation5], 0 }
   0x4   :  { %12 = vsyncpa [#allocation8], 0 }
   0x5   :  { %13 = vsyncpa [#allocation11], 0 }
   0x6   :  { %15 = vsyncpa [#allocation11 + $0x1], 0 }
   0x7   :  { %16 = vsyncpa [#allocation6], 0  ;;  %s5078_s21 = smov 0   ;;  %s5080_s22 = smov 0  }
   0x8   :  { %s5082_s23 = smov 0   ;;  %s5084_s24 = smov 0  }
   0x9 LB: > { %s5097_s25 = sadd.s32 4294967295, %s5026_s24   ;;  %s5100_s26 = sadd.s32 1, %s5026_s24   ;;  %s5026_s24 = sphi %s5084_s24, %s6006_s24   ;;  %s5022_s23 = sphi %s5082_s23, %s6010_s23   ;;  %s5018_s22 = sphi %s5080_s22, %s6009_s22   ;;  %s5014_s21 = sphi %s5078_s21, %s6008_s21  }
   0xa   : > { %5981 = sst [smem:[#allocation18_spill]] %s5100_s26  ;;  %s110_s27 = ssub.s32 %s5026_s24, %s5100_s26 }
   0xb   : > { %s113_s28 = sadd.s32 1, %s5022_s23  ;;  %p111_p0 = scmp.eq.s32.totalorder %s110_s27, 0 }
   0xc   : > { %p120_p1 = scmp.ne.s32.totalorder %s5022_s23, %s5018_s22  ;;  %p121_p2 = scmp.eq.s32.totalorder %s5026_s24, 0 }
   0xd   : > { %p126_p3 = scmp.ne.s32.totalorder %s5018_s22, %s5014_s21  ;;  %p5968_p5 = scmp.eq.s32.totalorder %s5097_s25, 0 }
   0xe   : > { %s5110_s29 = scalar_select %p111_p0, %s5022_s23, %s113_s28  }
   0xf   : > { %p5112_p4 = por %p121_p2, %p120_p1  ;;  %p3729_p6 = scmp.ge.s32.totalorder %s5026_s24, 1 }
  0x10   : > { %5982 = sst [smem:[#allocation19_spill]] %s5110_s29  ;;  %p184_p7 = scmp.lt.s32.totalorder %s5026_s24, 5 }
  0x11   : > { %p5121_p8 = por %p5968_p5, %p126_p3  ;;  %s5028_s9 = smov [#allocation7]  }
  0x12   : > { %p5126_p10 = pnand %p3729_p6, %p184_p7  ;;  %s212_s10 = sshll.u32 %s5028_s9, 4  ;;  %s213_s10 = int_to_ptr.vmem [resolvable:$true] %s212_s10 }
  0x13   : > { %s5984_s7 = scalar_select %p5121_p8, 1, 0 }
  0x14   : > { %s5985_s8 = scalar_select %p5126_p10, 1, 0 }
  0x15   : > { %p4347_p11 = pneg %p5126_p10  ;;  %p4367_p13 = scmp.lt.s32.totalorder %s5026_s24, 4 }
  0x16   : > { %s237_s12 = sand.u32 1, %s5026_s24   ;;  %s5976_s13 = sand.u32 1, %s5022_s23  }
  0x17   : > { %p5134_p12 = pnand %p4347_p11, %p5968_p5  ;;  %p5143_p0 = pnand %p4367_p13, %p5112_p4 }
  0x18   : > { %s5988_s2 = sld [smem:[#allocation20_spill]] }
  0x19   : > { %s5986_s11 = scalar_select %p5134_p12, 1, 0 }
  0x1a   : > { %s5987_s14 = scalar_select %p5143_p0, 1, 0 }
  0x1b   : > { %p5155_p2 = pneg %p5134_p12 }
  0x1e   : > { %s4810_s17 = scalar_lea.hbm %s5988_s2, 1920 }
  0x1f   : > { %p4811_p1 = scmp.ne.s32.totalorder %s5988_s2, %s4810_s17  ;;  %p4817_p6 = scmp.lt.u32.totalorder %s4810_s17, %s5988_s2 }
  0x21   : > { %p4813_p3 = pnand %p5155_p2, %p4811_p1 }
  0x23   : > { %p4814_p4 = pneg %p4813_p3 }
  0x25   : > { %p4819_p7 = pnand %p4817_p6, %p4814_p4 }
  0x27   : > { %4822 = shalt.err (!%p4819_p7)
}
  0x28   : > { %s4823_s28 = scalar_lea.vmem %s213_s10, 1920  ;;  %p4831_p5 = scmp.lt.s32.totalorder %s213_s10, %s213_s10 }
  0x29   : > { %p4824_p11 = scmp.ne.s32.totalorder %s213_s10, %s4823_s28  ;;  %p4832_p8 = scmp.lt.s32.totalorder %s4823_s28, %s4823_s28 }
  0x2b   : > { %p4826_p13 = pnand %p4824_p11, %p5155_p2  ;;  %p4833_p10 = por %p4832_p8, %p4831_p5 }
  0x2d   : > { %p4827_p9 = pneg %p4826_p13 }
  0x2f   : > { %p4834_p0 = pnand %p4833_p10, %p4827_p9 }
  0x31   : > { %4837 = shalt.err (!%p4834_p0)
}
  0x32   : > { %s5029_s30 = smov 128   ;;  %s5030_s9 = smov 8  }
  0x33   : > { %4353 = dma.hbm_to_vmem [thread:$0]  (!%p5134_p12), %s5988_s2, 1920, %s213_s10, [#allocation8], %s5029_s30, %s5029_s30, %s5030_s9  }
  0x34   : > { %s3734_s17 = sshll.u32 %s5976_s13, 11  ;;  %s4099_s18 = sshll.u32 %s5026_s24, 7 }
  0x35   : > { %s5990_s4 = sld [smem:[#allocation21_spill]]  ;;  %s241_s28 = scalar_lea.vmem [#allocation10], %s3734_s17 }
  0x36   : > { %s248_s29 = sshll.u32 %s241_s28, 4  ;;  %s5184_s26 = scalar_lea.sflag [#allocation11], %s237_s12  ;;  %s5182_s29 = int_to_ptr.vmem [resolvable:$true] %s248_s29 }
  0x37   : > { %p5991_p8 = scmp.ne.s32.totalorder %s5987_s14, 0 }
  0x39   : > { %p5977_p9 = pneg %p5991_p8 }
  0x3b   : > { %s5180_s27 = scalar_lea.hbm %s5990_s4, %s4099_s18  ;;  %s4843_s18 = scalar_lea.hbm %s5990_s4, 131072 }
  0x3c   : > { %s4838_s15 = scalar_lea.hbm %s5180_s27, 32768  ;;  %p4844_p1 = scmp.lt.u32.totalorder %s5180_s27, %s5990_s4 }
  0x3d   : > { %p4839_p5 = scmp.ne.s32.totalorder %s5180_s27, %s4838_s15  ;;  %p4845_p3 = scmp.lt.u32.totalorder %s4843_s18, %s4838_s15 }
  0x3e   : > { %p4847_p6 = scmp.lt.u32.totalorder %s4838_s15, %s5180_s27 }
  0x3f   : > { %p4841_p10 = pnand %p5977_p9, %p4839_p5  ;;  %p4846_p4 = por %p4845_p3, %p4844_p1 }
  0x41   : > { %p4842_p0 = pneg %p4841_p10  ;;  %p4848_p7 = por %p4847_p6, %p4846_p4 }
  0x43   : > { %p4849_p11 = pnand %p4848_p7, %p4842_p0 }
  0x45   : > { %4852 = shalt.err (!%p4849_p11)
}
  0x46   : > { %s4853_s12 = scalar_lea.vmem %s5182_s29, 32768  ;;  %s5031_s17 = smov [#allocation10]  }
  0x47   : > { %p4854_p13 = scmp.ne.s32.totalorder %s5182_s29, %s4853_s12  ;;  %s4858_s28 = sshll.u32 %s5031_s17, 4  ;;  %s4859_s28 = int_to_ptr.vmem [resolvable:$false] %s4858_s28 }
  0x48   : > { %s4860_s10 = scalar_lea.vmem %s4859_s28, 65536  ;;  %p4861_p12 = scmp.lt.s32.totalorder %s5182_s29, %s4859_s28 }
  0x49   : > { %p4856_p5 = pnand %p4854_p13, %p5977_p9  ;;  %p4862_p1 = scmp.lt.s32.totalorder %s4860_s10, %s4853_s12 }
  0x4b   : > { %p4857_p10 = pneg %p4856_p5  ;;  %p4863_p3 = por %p4862_p1, %p4861_p12 }
  0x4d   : > { %p4864_p4 = pnand %p4863_p3, %p4857_p10 }
  0x4f   : > { %4867 = shalt.err (!%p4864_p4)
}
  0x50   : > { %s5032_s15 = smov 512   ;;  %s5033_s16 = smov [#allocation4]  }
  0x51   : > { %4360 = dma.hbm_to_vmem [thread:$0]  (!%p5991_p8), %s5180_s27, 32768, %s5182_s29, %s5184_s26, %s5032_s15, %s5029_s30, %s5030_s9  }
  0x52   : > { %s199_s18 = sshll.u32 %s5033_s16, 4  ;;  %s4868_s12 = scalar_lea.hbm %s5962_s1, 512  ;;  %s200_s18 = int_to_ptr.vmem [resolvable:$true] %s199_s18 }
  0x53   : > { %p4869_p12 = scmp.ne.s32.totalorder %s5962_s1, %s4868_s12  ;;  %p4875_p7 = scmp.lt.u32.totalorder %s4868_s12, %s5962_s1 }
  0x55   : > { %p4871_p0 = pnand %p4869_p12, %p5155_p2 }
  0x57   : > { %p4872_p6 = pneg %p4871_p0 }
  0x59   : > { %p4877_p11 = pnand %p4875_p7, %p4872_p6 }
  0x5b   : > { %4880 = shalt.err (!%p4877_p11)
}
  0x5c   : > { %s4881_s29 = scalar_lea.vmem %s200_s18, 512  ;;  %p4889_p1 = scmp.lt.s32.totalorder %s200_s18, %s200_s18 }
  0x5d   : > { %p4882_p13 = scmp.ne.s32.totalorder %s200_s18, %s4881_s29  ;;  %p4890_p3 = scmp.lt.s32.totalorder %s4881_s29, %s4881_s29 }
  0x5f   : > { %p4884_p5 = pnand %p4882_p13, %p5155_p2  ;;  %p4891_p4 = por %p4890_p3, %p4889_p1 }
  0x61   : > { %p4885_p10 = pneg %p4884_p5 }
  0x63   : > { %p4892_p9 = pnand %p4891_p4, %p4885_p10 }
  0x65   : > { %4895 = shalt.err (!%p4892_p9)
}
  0x66   : > { %s5034_s30 = smov 256   ;;  %s5035_s13 = smov 16  }
  0x67   : > { %p5992_p12 = scmp.ne.s32.totalorder %s5986_s11, 0  ;;  %s5993_s15 = sand.u32 1, %s5022_s23  }
  0x68   : > { %s3737_s16 = sshll.u32 %s5993_s15, 1  ;;  %s5036_s19 = smov [#allocation9]  }
  0x69   : > { %4350 = dma.hbm_to_vmem [thread:$0]  (!%p5992_p12), %s5962_s1, 512, %s200_s18, [#allocation5], %s5034_s30, %s5034_s30, %s5035_s13  }
  0x6a   : > { %s226_s21 = sshll.u32 %s5036_s19, 4  ;;  %s4100_s12 = sshll.u32 %s5026_s24, 5  ;;  %s227_s21 = int_to_ptr.vmem [resolvable:$true] %s226_s21 }
  0x6b   : > { %s4896_s10 = scalar_lea.hbm %s5964_s3, 16 }
  0x6c   : > { %p4897_p9 = scmp.ne.s32.totalorder %s5964_s3, %s4896_s10  ;;  %p4903_p7 = scmp.lt.u32.totalorder %s4896_s10, %s5964_s3 }
  0x6e   : > { %p4899_p0 = pnand %p4897_p9, %p5155_p2 }
  0x70   : > { %p4900_p6 = pneg %p4899_p0 }
  0x72   : > { %p4905_p11 = pnand %p4903_p7, %p4900_p6 }
  0x74   : > { %4908 = shalt.err (!%p4905_p11)
}
  0x75   : > { %s4909_s18 = scalar_lea.vmem %s227_s21, 16  ;;  %s4916_s24 = scalar_lea.vmem %s227_s21, 32 }
  0x76   : > { %p4910_p13 = scmp.ne.s32.totalorder %s227_s21, %s4909_s18  ;;  %p4917_p1 = scmp.lt.s32.totalorder %s227_s21, %s227_s21 }
  0x77   : > { %p4918_p3 = scmp.lt.s32.totalorder %s4916_s24, %s4909_s18 }
  0x78   : > { %p4912_p5 = pnand %p4910_p13, %p5155_p2 }
  0x79   : > { %p4919_p4 = por %p4918_p3, %p4917_p1 }
  0x7a   : > { %p4913_p10 = pneg %p4912_p5 }
  0x7c   : > { %p4920_p8 = pnand %p4919_p4, %p4913_p10 }
  0x7e   : > { %4923 = shalt.err (!%p4920_p8)
}
  0x7f   : > { %4356 = dma.hbm_to_vmem [thread:$0]  (!%p5992_p12), %s5964_s3, 16, %s227_s21, [#allocation8]  }
  0x80   : > { %s5256_s27 = scalar_lea.hbm %s5966_s5, %s4100_s12  ;;  %s262_s20 = scalar_lea.vmem [#allocation12], %s3737_s16 }
  0x81   : > { %s270_s15 = sshll.u32 %s262_s20, 4  ;;  %s4924_s19 = scalar_lea.hbm %s5256_s27, 32  ;;  %s271_s15 = int_to_ptr.vmem [resolvable:$true] %s270_s15 }
  0x82   : > { %p4925_p2 = scmp.ne.s32.totalorder %s5256_s27, %s4924_s19  ;;  %p5994_p8 = scmp.ne.s32.totalorder %s5987_s14, 0 }
  0x83   : > { %s4929_s17 = scalar_lea.hbm %s5966_s5, 128  ;;  %p4930_p12 = scmp.lt.u32.totalorder %s5256_s27, %s5966_s5 }
  0x84   : > { %p5995_p9 = pneg %p5994_p8  ;;  %p4931_p7 = scmp.lt.u32.totalorder %s4929_s17, %s4924_s19 }
  0x85   : > { %p4933_p13 = scmp.lt.u32.totalorder %s4924_s19, %s5256_s27 }
  0x86   : > { %p4927_p0 = pnand %p4925_p2, %p5995_p9  ;;  %p4932_p11 = por %p4931_p7, %p4930_p12 }
  0x88   : > { %p4928_p6 = pneg %p4927_p0  ;;  %p4934_p5 = por %p4933_p13, %p4932_p11 }
  0x8a   : > { %p4935_p10 = pnand %p4934_p5, %p4928_p6 }
  0x8c   : > { %4938 = shalt.err (!%p4935_p10)
}
  0x8d   : > { %s4939_s16 = scalar_lea.vmem %s271_s15, 32  ;;  %p5996_p3 = pmov %p5995_p9 }
  0x8e   : > { %p4940_p1 = scmp.ne.s32.totalorder %s271_s15, %s4939_s16  ;;  %s5037_s10 = smov [#allocation12]  }
  0x8f   : > { %s4944_s29 = sshll.u32 %s5037_s10, 4  ;;  %s4945_s29 = int_to_ptr.vmem [resolvable:$false] %s4944_s29 }
  0x90   : > { %p4942_p4 = pnand %p4940_p1, %p5996_p3  ;;  %s4946_s9 = scalar_lea.vmem %s4945_s29, 64 }
  0x91   : > { %p4947_p9 = scmp.lt.s32.totalorder %s271_s15, %s4945_s29  ;;  %p4948_p0 = scmp.lt.s32.totalorder %s4946_s9, %s4939_s16 }
  0x92   : > { %p4943_p2 = pneg %p4942_p4 }
  0x93   : > { %p4949_p7 = por %p4948_p0, %p4947_p9 }
  0x95   : > { %p4950_p12 = pnand %p4949_p7, %p4943_p2 }
  0x97   : > { %4953 = shalt.err (!%p4950_p12)
}
  0x98   : > { %4363 = dma.hbm_to_vmem [thread:$0]  (!%p5994_p8), %s5256_s27, 32, %s271_s15, %s5184_s26  }
  0x99   : > { %p5997_p6 = scmp.ne.s32.totalorder %s5985_s8, 0 }
  0x9a   : > { %p5998_p11 = scmp.eq.s32.totalorder (!%p5997_p6), %s5097_s25, 0 }
  0x9b   : > { %279 = sbr.rel (%p5997_p6) target bundleno = 1815 (0x717), region = 44 }
  0xa2   : > { %4997 = dma.done.wait (%p5998_p11), [#allocation5], 512   ;;  %p5999_p13 = pmov %p5998_p11 }
  0xa3   : > { %p6000_p5 = pmov %p5998_p11 }
  0xa4   : > { %4999 = vsyncadd (%p5999_p13), [#allocation5], 4294966784 }
  0xa5   : > { %5001 = dma.done.wait (%p6000_p5), [#allocation8], 1936   ;;  %p6001_p10 = pmov %p6000_p5 }
  0xa6   : > { %s293_s14 = sand.u32 1, %s5097_s25   ;;  %s295_s26 = sand.u32 1, %s5018_s22  }
  0xa7   : > { %5003 = vsyncadd (%p6001_p10), [#allocation8], 4294965360  ;;  %s3744_s18 = sshll.u32 %s295_s26, 11  ;;  %s294_s8 = scalar_lea.sflag [#allocation11], %s293_s14 }
  0xa8   : > { %s5290_s24 = scalar_lea.vmem [#allocation10], %s3744_s18  ;;  %p6002_p8 = scmp.ne.s32.totalorder %s5984_s7, 0 }
  0xaa   : > { %5005 = dma.done.wait (%p6002_p8), %s294_s8, 32800  }
  0xab   : > { %5007 = vsyncadd (%p6002_p8), %s294_s8, 4294934496  ;;  %s5296_s2 = sshll.u32 %s295_s26, 1  ;;  %p6003_p1 = scmp.ne.s32.totalorder %s5097_s25, 0 }
  0xac   : > { %s306_s30 = scalar_lea.vmem [#allocation12], %s5296_s2  ;;  %v347_v0 = vld [vmem:[%s5961_s0 + $0x8] sm:$0xff] (!%p6003_p1)  ;;  %v349_v1 = vld [vmem:[%s5961_s0 + $0x18] sm:$0xff] (!%p6003_p1)  ;;  %vm376_vm0 = vcmask (!%p6003_p1), 556032   ;;  %v346_v2 = vld [vmem:[%s5961_s0] sm:$0xff] (!%p6003_p1)  ;;  %vm532_vm2 = vcmask (!%p6003_p1), 1043456  }
  0xad   : > { %341 = sbr.rel (%p6003_p1) target bundleno = 953 (0x3b9), region = 68  ;;  %v4201_v3 = vpack.c.bf16 (!%p6003_p1), %v349_v1, %v347_v0  ;;  %vm5312_vm1 = vmpackc.low (!%p6003_p1), %vm376_vm0, %vm376_vm0  ;;  %v348_v5 = vld [vmem:[%s5961_s0 + $0x10] sm:$0xff] (!%p6003_p1)  ;;  %v351_v6 = vld [vmem:[%s5961_s0 + $0x28] sm:$0xff] (!%p6003_p1)  ;;  %vm525_vm3 = vcmask (!%p6003_p1), 949248  }
  0xae   : > { %v4204_v7 = vpack.c.bf16 (!%p6003_p1), %v348_v5, %v346_v2  ;;  %v353_v8 = vld [vmem:[%s5961_s0 + $0x38] sm:$0xff] (!%p6003_p1)  ;;  %v350_v10 = vld [vmem:[%s5961_s0 + $0x20] sm:$0xff] (!%p6003_p1)  ;;  %v352_v11 = vld [vmem:[%s5961_s0 + $0x30] sm:$0xff] (!%p6003_p1) }
  0xaf   : > { %4203 = vmatprep.subr.msk.bf16.mxu0 (!%p6003_p1), %vm5312_vm1, %v4201_v3  ;;  %v4206_v9 = vpack.c.bf16 (!%p6003_p1), %v353_v8, %v351_v6  ;;  %v355_v12 = vld [vmem:[%s5961_s0 + $0x48] sm:$0xff] (!%p6003_p1)  ;;  %v357_v13 = vld [vmem:[%s5961_s0 + $0x58] sm:$0xff] (!%p6003_p1)  ;;  %v4209_v14 = vpack.c.bf16 (!%p6003_p1), %v352_v11, %v350_v10  ;;  %v503_v17 = vld [vmem:[#allocation7] sm:$0xff] (!%p6003_p1) }
  0xb0   : > { %4205 = vmatpush1.bf16.xpose.msra.mxu0 (!%p6003_p1), %v4204_v7  ;;  %v4211_v15 = vpack.c.bf16 (!%p6003_p1), %v357_v13, %v355_v12  ;;  %v5341_v16 = vld [vmem:[#allocation4 + $0x8] sm:$0xff] (!%p6003_p1)  ;;  %v505_v19 = vld [vmem:[#allocation7 + $0x10] sm:$0xff] (!%p6003_p1)  ;;  %v506_v20 = vld [vmem:[#allocation7 + $0x18] sm:$0xff] (!%p6003_p1) }
  0xb1   : > { %4208 = vmatprep.subr.msk.bf16.mxu0 (!%p6003_p1), %vm5312_vm1, %v4206_v9  ;;  %3762 = vmatprep.mubr.msk.f32.mxu0 (!%p6003_p1), %vm376_vm0, %v5341_v16  ;;  %v504_v18 = vld [vmem:[#allocation7 + $0x8] sm:$0xff] (!%p6003_p1)  ;;  %v354_v21 = vld [vmem:[%s5961_s0 + $0x40] sm:$0xff] (!%p6003_p1)  ;;  %v356_v22 = vld [vmem:[%s5961_s0 + $0x50] sm:$0xff] (!%p6003_p1)  ;;  %v5358_v25 = vpack.c.bf16 (!%p6003_p1), %v506_v20, %v505_v19 }
  0xb2   : > { %v359_v23 = vld [vmem:[%s5961_s0 + $0x68] sm:$0xff] (!%p6003_p1)  ;;  %v5356_v24 = vpack.c.bf16 (!%p6003_p1), %v504_v18, %v503_v17  ;;  %v361_v26 = vld [vmem:[%s5961_s0 + $0x78] sm:$0xff] (!%p6003_p1)  ;;  %v507_v27 = vld [vmem:[#allocation7 + $0x20] sm:$0xff] (!%p6003_p1)  ;;  %v4214_v29 = vpack.c.bf16 (!%p6003_p1), %v356_v22, %v354_v21 }
  0xb3   : > { %v508_v28 = vld [vmem:[#allocation7 + $0x28] sm:$0xff] (!%p6003_p1)  ;;  %v4216_v30 = vpack.c.bf16 (!%p6003_p1), %v361_v26, %v359_v23  ;;  %v509_v32 = vld [vmem:[#allocation7 + $0x30] sm:$0xff] (!%p6003_p1)  ;;  %v510_v33 = vld [vmem:[#allocation7 + $0x38] sm:$0xff] (!%p6003_p1) }
  0xb4   : > { %4237 = vmatprep.subr.bf16.mxu1 %v5356_v24  ;;  %v5366_v31 = vpack.c.bf16 %v508_v28, %v507_v27  ;;  %v358_v34 = vld [vmem:[%s5961_s0 + $0x60] sm:$0xff]  ;;  %v360_v35 = vld [vmem:[%s5961_s0 + $0x70] sm:$0xff]  ;;  %v363_v36 = vld [vmem:[%s5961_s0 + $0x88] sm:$0xff]  ;;  %v5381_v37 = vpack.c.bf16 %v510_v33, %v509_v32 }
  0xb5   : > { %4239 = vmatpush3.bf16.msra.mxu1 %v5356_v24  ;;  %v365_v38 = vld [vmem:[%s5961_s0 + $0x98] sm:$0xff]  ;;  %v511_v39 = vld [vmem:[#allocation7 + $0x40] sm:$0xff]  ;;  %v4219_v41 = vpack.c.bf16 %v360_v35, %v358_v34  ;;  %v513_v44 = vld [vmem:[#allocation7 + $0x50] sm:$0xff] }
  0xb6   : > { %4241 = vmatprep.subr.bf16.mxu1 %v5358_v25  ;;  %v512_v40 = vld [vmem:[#allocation7 + $0x48] sm:$0xff]  ;;  %v4221_v42 = vpack.c.bf16 %v365_v38, %v363_v36  ;;  %v514_v45 = vld [vmem:[#allocation7 + $0x58] sm:$0xff]  ;;  %v362_v46 = vld [vmem:[%s5961_s0 + $0x80] sm:$0xff] }
  0xb7   : > { %v4252_v43 = vpack.c.bf16 %v512_v40, %v511_v39  ;;  %v364_v47 = vld [vmem:[%s5961_s0 + $0x90] sm:$0xff]  ;;  %v367_v48 = vld [vmem:[%s5961_s0 + $0xa8] sm:$0xff]  ;;  %v4256_v49 = vpack.c.bf16 %v514_v45, %v513_v44  ;;  %v369_v50 = vld [vmem:[%s5961_s0 + $0xb8] sm:$0xff] }
  0xb8   : > { %4210 = vmatpush1.bf16.xpose.msra.mxu0 %v4209_v14  ;;  %v515_v51 = vld [vmem:[#allocation7 + $0x60] sm:$0xff]  ;;  %v516_v52 = vld [vmem:[#allocation7 + $0x68] sm:$0xff]  ;;  %v4224_v53 = vpack.c.bf16 %v364_v47, %v362_v46  ;;  %v4226_v54 = vpack.c.bf16 %v369_v50, %v367_v48  ;;  %v366_v56 = vld [vmem:[%s5961_s0 + $0xa0] sm:$0xff] }
  0xb9   : > { %4213 = vmatprep.subr.msk.bf16.mxu0 %vm5312_vm1, %v4211_v15  ;;  %4243 = vmatpush3.bf16.msra.mxu1 %v5358_v25  ;;  %v4260_v55 = vpack.c.bf16 %v516_v52, %v515_v51  ;;  %v368_v57 = vld [vmem:[%s5961_s0 + $0xb0] sm:$0xff]  ;;  %v371_v58 = vld [vmem:[%s5961_s0 + $0xc8] sm:$0xff]  ;;  %v373_v59 = vld [vmem:[%s5961_s0 + $0xd8] sm:$0xff] }
  0xba   : > { %4245 = vmatprep.subr.bf16.mxu1 %v5366_v31  ;;  %v517_v60 = vld [vmem:[#allocation7 + $0x70] sm:$0xf]  ;;  %v4229_v61 = vpack.c.bf16 %v368_v57, %v366_v56  ;;  %v4231_v62 = vpack.c.bf16 %v373_v59, %v371_v58  ;;  %v372_v0 = vld [vmem:[%s5961_s0 + $0xd0] sm:$0xff]  ;;  %v375_v2 = vld [vmem:[%s5961_s0 + $0xe8] sm:$0xf]  ;;  %v617_v58 = vlaneseq }
  0xbb   : > { %v370_v63 = vld [vmem:[%s5961_s0 + $0xc0] sm:$0xff]  ;;  %v5434_v5 = vld [vmem:[#allocation4] sm:$0xff]  ;;  %v5436_v6 = vld [vmem:[#allocation4 + $0x18] sm:$0xff]  ;;  %v5038_v56 = vmov 1966171168  }
  0xbc   : > { %v4234_v1 = vpack.c.bf16 %v372_v0, %v370_v63  ;;  %v374_v3 = vld [vmem:[%s5961_s0 + $0xe0] sm:$0xf]  ;;  %v3777_v8 = vld [vmem:[%s5961_s0 + $0xf8] sm:$0xff]  ;;  %v3779_v9 = vld [vmem:[%s5961_s0 + $0x108] sm:$0xff]  ;;  %v615_v57 = vunpack.c.l.s4 %v5038_v56 }
  0xbd   : > { %4247 = vmatpush3.bf16.msra.mxu1 %v5366_v31  ;;  %v5442_v7 = vld [vmem:[#allocation4 + $0x10] sm:$0xff]  ;;  %v4264_v10 = vpack.c.bf16 %v3779_v9, %v3777_v8  ;;  %v3776_v11 = vld [vmem:[%s5961_s0 + $0xf0] sm:$0xff]  ;;  %v3781_v14 = vld [vmem:[%s5961_s0 + $0x118] sm:$0xff] }
  0xbe   : > { %4249 = vmatprep.subr.bf16.mxu1 %v5381_v37  ;;  %v3778_v12 = vld [vmem:[%s5961_s0 + $0x100] sm:$0xff]  ;;  %v3783_v15 = vld [vmem:[%s5961_s0 + $0x128] sm:$0xff]  ;;  %v3780_v22 = vld [vmem:[%s5961_s0 + $0x110] sm:$0xff]  ;;  %v616_v59 = vunpack.c.0.s8 %v615_v57 }
  0xbf   : > { %v4267_v18 = vpack.c.bf16 %v3778_v12, %v3776_v11  ;;  %v4269_v19 = vpack.c.bf16 %v3783_v15, %v3781_v14  ;;  %v3782_v23 = vld [vmem:[%s5961_s0 + $0x120] sm:$0xff]  ;;  %v3784_v27 = vld [vmem:[%s5961_s0 + $0x130] sm:$0xff]  ;;  %v3793_v35 = vld [vmem:[%s5961_s0 + $0x178] sm:$0xff] }
  0xc0   : > { %4215 = vmatpush1.bf16.xpose.msra.mxu0 %v4214_v29  ;;  %v3786_v28 = vld [vmem:[%s5961_s0 + $0x140] sm:$0xff]  ;;  %v3789_v29 = vld [vmem:[%s5961_s0 + $0x158] sm:$0xff]  ;;  %v3788_v33 = vld [vmem:[%s5961_s0 + $0x150] sm:$0xff] }
  0xc1   : > { %4218 = vmatprep.subr.msk.bf16.mxu0 %vm5312_vm1, %v4216_v30  ;;  %4251 = vmatpush3.bf16.msra.mxu1 %v5381_v37  ;;  %v3791_v30 = vld [vmem:[%s5961_s0 + $0x168] sm:$0xff]  ;;  %v3790_v34 = vld [vmem:[%s5961_s0 + $0x160] sm:$0xff]  ;;  %v3792_v39 = vld [vmem:[%s5961_s0 + $0x170] sm:$0xff] }
  0xc2   : > { %4253 = vmatprep.subr.bf16.mxu1 %v4252_v43  ;;  %v4279_v32 = vpack.c.bf16 %v3791_v30, %v3789_v29  ;;  %v3795_v36 = vld [vmem:[%s5961_s0 + $0x188] sm:$0xff]  ;;  %v3794_v40 = vld [vmem:[%s5961_s0 + $0x180] sm:$0xff]  ;;  %v3796_v45 = vld [vmem:[%s5961_s0 + $0x190] sm:$0xff] }
  0xc3   : > { %v4284_v38 = vpack.c.bf16 %v3795_v36, %v3793_v35  ;;  %v3798_v46 = vld [vmem:[%s5961_s0 + $0x1a0] sm:$0xff]  ;;  %v3801_v47 = vld [vmem:[%s5961_s0 + $0x1b8] sm:$0xff]  ;;  %v3803_v48 = vld [vmem:[%s5961_s0 + $0x1c8] sm:$0xff] }
  0xc4   : > { %v4294_v50 = vpack.c.bf16 %v3803_v48, %v3801_v47  ;;  %v3800_v51 = vld [vmem:[%s5961_s0 + $0x1b0] sm:$0xff]  ;;  %v3802_v52 = vld [vmem:[%s5961_s0 + $0x1c0] sm:$0xff] }
  0xc5   : > { %4255 = vmatpush3.bf16.msra.mxu1 %v4252_v43  ;;  %v3804_v4 = vld [vmem:[%s5961_s0 + $0x1d0] sm:$0xf] }
  0xc6   : > { %4257 = vmatprep.subr.bf16.mxu1 %v4256_v49 }
  0xc8   : > { %4220 = vmatpush1.bf16.xpose.msra.mxu0 %v4219_v41  ;;  %v3797_v41 = vld [vmem:[%s5961_s0 + $0x198] sm:$0xff] }
  0xc9   : > { %4223 = vmatprep.subr.msk.bf16.mxu0 %vm5312_vm1, %v4221_v42  ;;  %4259 = vmatpush3.bf16.msra.mxu1 %v4256_v49  ;;  %v3799_v42 = vld [vmem:[%s5961_s0 + $0x1a8] sm:$0xff] }
  0xca   : > { %4261 = vmatprep.subr.bf16.mxu1 %v4260_v55  ;;  %v4289_v44 = vpack.c.bf16 %v3799_v42, %v3797_v41 }
  0xcd   : > { %4263 = vmatpush3.bf16.msra.mxu1 %v4260_v55 }
  0xce   : > { %4163 = vmatprep.subr.msk.mxu1 %vm532_vm2, %v517_v60 }
  0xd0   : > { %4225 = vmatpush1.bf16.xpose.msra.mxu0 %v4224_v53  ;;  %v4297_v53 = vpack.c.bf16 %v3802_v52, %v3800_v51 }
  0xd1   : > { %4228 = vmatprep.subr.msk.bf16.mxu0 %vm5312_vm1, %v4226_v54  ;;  %4164 = vmatpush3.msk.msra.mxu1 %vm532_vm2, %v517_v60  ;;  %v3805_v54 = vld [vmem:[%s5961_s0 + $0x1d8] sm:$0xf]  ;;  %v618_v60 = vshrl.u32 %v617_v58, 7 }
  0xd2   : > { %4266 = vmatprep.subr.msk.bf16.mxu1 %vm5312_vm1, %v4264_v10 }
  0xd8   : > { %4230 = vmatpush1.bf16.xpose.msra.mxu0 %v4229_v61  ;;  %v3764_v61 = vld [vmem:[#allocation9] ss:$0 sm:$0xff] }
  0xd9   : > { %4233 = vmatprep.subr.msk.bf16.mxu0 %vm5312_vm1, %v4231_v62  ;;  %v5567_v62 = vsub.s32 %v616_v59, %v618_v60 }
  0xe0   : > { %4235 = vmatpush1.bf16.xpose.msra.mxu0 %v4234_v1 }
  0xe1   : > { %3761 = vmatprep.subr.msk.mxu0 %vm376_vm0, %v375_v2 }
  0xe8   : > { %457 = vmatpush1.xpose.msra.mxu0 %v374_v3 }
  0xe9   : > { %4300 = vmatprep.subr.bf16.mxu0 %v5356_v24 }
  0xeb   : > { %493 = vmatmul.mubr.f32.vlgmr.msra.gmra.mrb[0].mxu0 %v5434_v5 }
  0xec   : > { %3763 = vmatprep.mubr.msk.f32.mxu0 %vm376_vm0, %v5436_v6  ;;  %4302 = vmatpush3.bf16.msra.mxu0 %v5356_v24  ;;  %v3785_v24 = vld [vmem:[%s5961_s0 + $0x138] sm:$0xff] }
  0xed   : > { %4304 = vmatprep.subr.bf16.mxu0 %v5358_v25 }
  0xef   : > { %498 = vmatmul.mubr.f32.gmra.mrb[2].mxu0 %v5442_v7 }
  0xf0   : > { %4306 = vmatpush3.bf16.msra.mxu0 %v5358_v25  ;;  %v3787_v25 = vld [vmem:[%s5961_s0 + $0x148] sm:$0xff] }
  0xf1   : > { %4308 = vmatprep.subr.bf16.mxu0 %v5366_v31  ;;  %v4274_v26 = vpack.c.bf16 %v3787_v25, %v3785_v24 }
  0xf4   : > { %4310 = vmatpush3.bf16.msra.mxu0 %v5366_v31  ;;  %v4277_v31 = vpack.c.bf16 %v3786_v28, %v3784_v27 }
  0xf5   : > { %4312 = vmatprep.subr.bf16.mxu0 %v5381_v37 }
  0xf8   : > { %4314 = vmatpush3.bf16.msra.mxu0 %v5381_v37  ;;  %v4282_v37 = vpack.c.bf16 %v3790_v34, %v3788_v33 }
  0xf9   : > { %4316 = vmatprep.subr.bf16.mxu0 %v4252_v43 }
  0xfc   : > { %4318 = vmatpush3.bf16.msra.mxu0 %v4252_v43  ;;  %v4287_v43 = vpack.c.bf16 %v3794_v40, %v3792_v39 }
  0xfd   : > { %4320 = vmatprep.subr.bf16.mxu0 %v4256_v49 }
 0x100   : > { %4322 = vmatpush3.bf16.msra.mxu0 %v4256_v49  ;;  %v4292_v49 = vpack.c.bf16 %v3798_v46, %v3796_v45 }
 0x101   : > { %4324 = vmatprep.subr.bf16.mxu0 %v4260_v55 }
 0x104   : > { %4326 = vmatpush3.bf16.msra.mxu0 %v4260_v55  ;;  %v918_v55 = vld [vmem:[#allocation7 + $0x70] sm:$0xf] }
 0x105   : > { %4196 = vmatprep.subr.msk.mxu0 %vm532_vm2, %v918_v55 }
 0x108   : > { %4197 = vmatpush3.msk.msra.mxu0 %vm532_vm2, %v918_v55 }
 0x1be   : > { %v494_v13 = vpop.f32.mrb[0].mxu0 }
 0x1bf   : > { %v496_v17 = vpop.f32.mrb[1].mxu0  ;;  %4165 = vmatprep.mubr.msk.f32.mxu1 %vm525_vm3, %v494_v13 }
 0x1c2   : > { %v499_v20 = vpop.f32.mrb[2].mxu0 }
 0x1c3   : > { %v501_v21 = vpop.f32.mrb[3].mxu0  ;;  %4166 = vmatmul.mubr.msk.f32.vlgmr.msra.gmra.mrb[0].mxu1 %vm525_vm3, %v499_v20 }
 0x1c4   : > { %4268 = vmatpush1.bf16.xpose.msra.mxu1 %v4267_v18  ;;  %3821 = vmatprep.mubr.msk.f32.mxu1 %vm376_vm0, %v5341_v16  ;;  %v4272_v16 = vpack.c.bf16 %v3782_v23, %v3780_v22 }
 0x1c5   : > { %4271 = vmatprep.subr.msk.bf16.mxu1 %vm5312_vm1, %v4269_v19 }
 0x1cc   : > { %4273 = vmatpush1.bf16.xpose.msra.mxu1 %v4272_v16 }
 0x1cd   : > { %4276 = vmatprep.subr.msk.bf16.mxu1 %vm5312_vm1, %v4274_v26 }
 0x1d4   : > { %4278 = vmatpush1.bf16.xpose.msra.mxu1 %v4277_v31 }
 0x1d5   : > { %4281 = vmatprep.subr.msk.bf16.mxu1 %vm5312_vm1, %v4279_v32 }
 0x1dc   : > { %4283 = vmatpush1.bf16.xpose.msra.mxu1 %v4282_v37 }
 0x1dd   : > { %4286 = vmatprep.subr.msk.bf16.mxu1 %vm5312_vm1, %v4284_v38 }
 0x1e4   : > { %4288 = vmatpush1.bf16.xpose.msra.mxu1 %v4287_v43 }
 0x1e5   : > { %4291 = vmatprep.subr.msk.bf16.mxu1 %vm5312_vm1, %v4289_v44 }
 0x1ec   : > { %4293 = vmatpush1.bf16.xpose.msra.mxu1 %v4292_v49 }
 0x1ed   : > { %4296 = vmatprep.subr.msk.bf16.mxu1 %vm5312_vm1, %v4294_v50 }
 0x1f4   : > { %4298 = vmatpush1.bf16.xpose.msra.mxu1 %v4297_v53 }
 0x1f5   : > { %3820 = vmatprep.subr.msk.mxu1 %vm376_vm0, %v3805_v54 }
 0x1fc   : > { %858 = vmatpush1.xpose.msra.mxu1 %v3804_v4 }
 0x1ff   : > { %894 = vmatmul.mubr.f32.vlgmr.msra.gmra.mrb[2].mxu1 %v5434_v5 }
 0x200   : > { %3822 = vmatprep.mubr.msk.f32.mxu1 %vm376_vm0, %v5436_v6 }
 0x203   : > { %899 = vmatmul.mubr.f32.gmra.mrb[4].mxu1 %v5442_v7 }
 0x296   : > { %v4167_v63 = vpop.f32.mrb[0].mxu1 }
 0x297   : > { %v608_v0 = vadd.f32 %v4167_v63, %v3764_v61  ;;  %v602_v1 = vpop.f32.mrb[1].mxu1 }
 0x298   : > { %v603_v2 = vadd.f32 %v3764_v61, %v602_v1 }
 0x299   : > { %v662_v3 = vcombine.high %v608_v0, %v608_v0  ;;  %v669_v5 = vrot.slane %v608_v0, %v5567_v62 }
 0x29a   : > { %v613_v6 = vcombine.high %v603_v2, %v603_v2  ;;  %v620_v7 = vrot.slane %v603_v2, %v5567_v62 }
 0x29b   : > { %v676_v8 = vrot.slane %v662_v3, %v5567_v62  ;;  %v677_v9 = vcombine.high %v669_v5, %v669_v5  ;;  %v685_v10 = vrot.slane %v669_v5, %v5567_v62  ;;  %3772 = vst.sshfl [vmem:[#allocation2 + $0x10] sm:$0x1 pattern:$0x73625140] %v669_v5 }
 0x29c   : > { %v627_v11 = vrot.slane %v613_v6, %v5567_v62  ;;  %v628_v12 = vcombine.high %v620_v7, %v620_v7  ;;  %v636_v13 = vrot.slane %v620_v7, %v5567_v62  ;;  %3768 = vst.sshfl [vmem:[#allocation2] sm:$0x1 pattern:$0x73625140] %v620_v7 }
 0x29d   : > { %v678_v14 = vcombine.high %v676_v8, %v676_v8  ;;  %v692_v15 = vrot.slane %v676_v8, %v5567_v62  ;;  %v699_v17 = vrot.slane %v677_v9, %v5567_v62  ;;  %v707_v18 = vcombine.high %v685_v10, %v685_v10  ;;  %3773 = vst.sshfl [vmem:[#allocation2 + $0x12] sm:$0x1 pattern:$0x73625140] %v677_v9 }
 0x29e   : > { %3774 = vst.sshfl [vmem:[#allocation2 + $0x18] sm:$0x1 pattern:$0x73625140] %v676_v8  ;;  %v629_v19 = vcombine.high %v627_v11, %v627_v11  ;;  %v643_v20 = vrot.slane %v627_v11, %v5567_v62  ;;  %v650_v21 = vrot.slane %v628_v12, %v5567_v62  ;;  %v658_v22 = vcombine.high %v636_v13, %v636_v13 }
 0x29f   : > { %3769 = vst.sshfl [vmem:[#allocation2 + $0x2] sm:$0x1 pattern:$0x73625140] %v628_v12  ;;  %v706_v23 = vrot.slane %v678_v14, %v5567_v62  ;;  %v708_v24 = vcombine.high %v692_v15, %v692_v15  ;;  %v709_v25 = vcombine.high %v699_v17, %v699_v17  ;;  %737 = vst [vmem:[#allocation2 + $0x14] sm:$0x1] %v707_v18 }
 0x2a0   : > { %3770 = vst.sshfl [vmem:[#allocation2 + $0x8] sm:$0x1 pattern:$0x73625140] %v627_v11  ;;  %v657_v16 = vrot.slane %v629_v19, %v5567_v62  ;;  %v659_v26 = vcombine.high %v643_v20, %v643_v20  ;;  %v660_v27 = vcombine.high %v650_v21, %v650_v21  ;;  %729 = vst [vmem:[#allocation2 + $0x4] sm:$0x1] %v658_v22 }
 0x2a1   : > { %3775 = vst.sshfl [vmem:[#allocation2 + $0x1a] sm:$0x1 pattern:$0x73625140] %v678_v14  ;;  %v710_v28 = vcombine.high %v706_v23, %v706_v23  ;;  %738 = vst [vmem:[#allocation2 + $0x16] sm:$0x1] %v709_v25 }
 0x2a2   : > { %3771 = vst.sshfl [vmem:[#allocation2 + $0xa] sm:$0x1 pattern:$0x73625140] %v629_v19  ;;  %741 = vst [vmem:[#allocation2 + $0x1c] sm:$0x1] %v708_v24  ;;  %v661_v29 = vcombine.high %v657_v16, %v657_v16 }
 0x2a3   : > { %730 = vst [vmem:[#allocation2 + $0x6] sm:$0x1] %v660_v27  ;;  %733 = vst [vmem:[#allocation2 + $0xc] sm:$0x1] %v659_v26 }
 0x2a4   : > { %742 = vst [vmem:[#allocation2 + $0x1e] sm:$0x1] %v710_v28  ;;  %734 = vst [vmem:[#allocation2 + $0xe] sm:$0x1] %v661_v29 }
 0x2d2   : > { %v895_v30 = vpop.f32.mrb[2].mxu1 }
 0x2d3   : > { %v897_v31 = vpop.f32.mrb[3].mxu1  ;;  %4198 = vmatprep.mubr.msk.f32.mxu0 %vm525_vm3, %v895_v30 }
 0x2d6   : > { %v900_v32 = vpop.f32.mrb[4].mxu1 }
 0x2d7   : > { %v902_v33 = vpop.f32.mrb[5].mxu1  ;;  %4199 = vmatmul.mubr.msk.f32.vlgmr.msra.gmra.mrb[4].mxu0 %vm525_vm3, %v900_v32 }
 0x3aa   : > { %v4200_v34 = vpop.f32.mrb[4].mxu0 }
 0x3ab   : > { %v1007_v35 = vadd.f32 %v4200_v34, %v3764_v61  ;;  %v1001_v36 = vpop.f32.mrb[5].mxu0 }
 0x3ac   : > { %v1002_v37 = vadd.f32 %v3764_v61, %v1001_v36 }
 0x3ad   : > { %v1061_v38 = vcombine.high %v1007_v35, %v1007_v35  ;;  %v1068_v39 = vrot.slane %v1007_v35, %v5567_v62 }
 0x3ae   : > { %v1012_v40 = vcombine.high %v1002_v37, %v1002_v37  ;;  %v1019_v41 = vrot.slane %v1002_v37, %v5567_v62 }
 0x3af   : > { %v1075_v42 = vrot.slane %v1061_v38, %v5567_v62  ;;  %v1076_v43 = vcombine.high %v1068_v39, %v1068_v39  ;;  %v1084_v44 = vrot.slane %v1068_v39, %v5567_v62  ;;  %3831 = vst.sshfl [vmem:[#allocation2 + $0x11] sm:$0x1 pattern:$0x73625140] %v1068_v39 }
 0x3b0   : > { %v1026_v45 = vrot.slane %v1012_v40, %v5567_v62  ;;  %v1027_v46 = vcombine.high %v1019_v41, %v1019_v41  ;;  %v1035_v47 = vrot.slane %v1019_v41, %v5567_v62  ;;  %3827 = vst.sshfl [vmem:[#allocation2 + $0x1] sm:$0x1 pattern:$0x73625140] %v1019_v41 }
 0x3b1   : > { %v1077_v48 = vcombine.high %v1075_v42, %v1075_v42  ;;  %v1091_v49 = vrot.slane %v1075_v42, %v5567_v62  ;;  %v1098_v50 = vrot.slane %v1076_v43, %v5567_v62  ;;  %v1106_v51 = vcombine.high %v1084_v44, %v1084_v44  ;;  %3832 = vst.sshfl [vmem:[#allocation2 + $0x13] sm:$0x1 pattern:$0x73625140] %v1076_v43 }
 0x3b2   : > { %3833 = vst.sshfl [vmem:[#allocation2 + $0x19] sm:$0x1 pattern:$0x73625140] %v1075_v42  ;;  %v1028_v52 = vcombine.high %v1026_v45, %v1026_v45  ;;  %v1042_v53 = vrot.slane %v1026_v45, %v5567_v62  ;;  %v1049_v54 = vrot.slane %v1027_v46, %v5567_v62  ;;  %v1057_v4 = vcombine.high %v1035_v47, %v1035_v47 }
 0x3b3   : > { %3828 = vst.sshfl [vmem:[#allocation2 + $0x3] sm:$0x1 pattern:$0x73625140] %v1027_v46  ;;  %v1105_v55 = vrot.slane %v1077_v48, %v5567_v62  ;;  %v1107_v56 = vcombine.high %v1091_v49, %v1091_v49  ;;  %v1108_v57 = vcombine.high %v1098_v50, %v1098_v50  ;;  %1136 = vst [vmem:[#allocation2 + $0x15] sm:$0x1] %v1106_v51 }
 0x3b4   : > { %3829 = vst.sshfl [vmem:[#allocation2 + $0x9] sm:$0x1 pattern:$0x73625140] %v1026_v45  ;;  %v1056_v58 = vrot.slane %v1028_v52, %v5567_v62  ;;  %v1058_v59 = vcombine.high %v1042_v53, %v1042_v53  ;;  %v1059_v60 = vcombine.high %v1049_v54, %v1049_v54  ;;  %1128 = vst [vmem:[#allocation2 + $0x5] sm:$0x1] %v1057_v4 }
 0x3b5   : > { %3834 = vst.sshfl [vmem:[#allocation2 + $0x1b] sm:$0x1 pattern:$0x73625140] %v1077_v48  ;;  %v1109_v61 = vcombine.high %v1105_v55, %v1105_v55  ;;  %1137 = vst [vmem:[#allocation2 + $0x17] sm:$0x1] %v1108_v57 }
 0x3b6   : > { %3830 = vst.sshfl [vmem:[#allocation2 + $0xb] sm:$0x1 pattern:$0x73625140] %v1028_v52  ;;  %1140 = vst [vmem:[#allocation2 + $0x1d] sm:$0x1] %v1107_v56  ;;  %v1060_v63 = vcombine.high %v1056_v58, %v1056_v58 }
 0x3b7   : > { %1129 = vst [vmem:[#allocation2 + $0x7] sm:$0x1] %v1059_v60  ;;  %1132 = vst [vmem:[#allocation2 + $0xd] sm:$0x1] %v1058_v59 }
 0x3b8   : > { %1141 = vst [vmem:[#allocation2 + $0x1f] sm:$0x1] %v1109_v61  ;;  %1133 = vst [vmem:[#allocation2 + $0xf] sm:$0x1] %v1060_v63 }
 0x3b9 PF: > { %v4418_v62 = vld [vmem:[%s5290_s24 + $0x4] ss:$8 sps:$4 sm:$0xff]   ;;  %v5039_v1 = vmov 0   ;;  %v4422_v2 = vld [vmem:[%s5290_s24] ss:$8 sps:$4 sm:$0xff]   ;;  %vm3366_vm4 = vcmask 1041408  }
 0x3ba   : > { %v4420_v0 = vld [vmem:[%s5290_s24 + $0x84] ss:$8 sps:$4 sm:$0xff]   ;;  %1542 = vmatprep.mubr.bf16.mxu0 %v5039_v1  ;;  %1663 = vmatprep.mubr.bf16.mxu1 %v5039_v1  ;;  %v4423_v3 = vld [vmem:[%s5290_s24 + $0x80] ss:$8 sps:$4 sm:$0xff]   ;;  %v4424_v5 = vld [vmem:[%s5290_s24 + $0x14] ss:$8 sps:$4 sm:$0xff]  }
 0x3bb   : > { %1510 = vmatprep.subr.bf16.mxu0 %v4418_v62  ;;  %1631 = vmatprep.subr.bf16.mxu1 %v4420_v0  ;;  %v4426_v6 = vld [vmem:[%s5290_s24 + $0x94] ss:$8 sps:$4 sm:$0xff]   ;;  %v4428_v7 = vld [vmem:[%s5290_s24 + $0x10] ss:$8 sps:$4 sm:$0xff]   ;;  %v4430_v9 = vld [vmem:[%s5290_s24 + $0x24] ss:$8 sps:$4 sm:$0xff]  }
 0x3bc   : > { %1511 = vmatpush1.bf16.msra.mxu0 %v4422_v2  ;;  %1632 = vmatpush1.bf16.msra.mxu1 %v4423_v3  ;;  %v4429_v8 = vld [vmem:[%s5290_s24 + $0x90] ss:$8 sps:$4 sm:$0xff]   ;;  %v4432_v10 = vld [vmem:[%s5290_s24 + $0xa4] ss:$8 sps:$4 sm:$0xff]   ;;  %v4434_v11 = vld [vmem:[%s5290_s24 + $0x20] ss:$8 sps:$4 sm:$0xff]  }
 0x3bd   : > { %1512 = vmatprep.subr.bf16.mxu0 %v4424_v5  ;;  %1633 = vmatprep.subr.bf16.mxu1 %v4426_v6  ;;  %v4435_v12 = vld [vmem:[%s5290_s24 + $0xa0] ss:$8 sps:$4 sm:$0xff]   ;;  %v4436_v13 = vld [vmem:[%s5290_s24 + $0x34] ss:$8 sps:$4 sm:$0xff]   ;;  %v4440_v15 = vld [vmem:[%s5290_s24 + $0x30] ss:$8 sps:$4 sm:$0xff]  }
 0x3be   : > { %v4438_v14 = vld [vmem:[%s5290_s24 + $0xb4] ss:$8 sps:$4 sm:$0xff]   ;;  %v4441_v17 = vld [vmem:[%s5290_s24 + $0xb0] ss:$8 sps:$4 sm:$0xff]   ;;  %v4442_v18 = vld [vmem:[%s5290_s24 + $0x44] ss:$8 sps:$4 sm:$0xff]  }
 0x3bf   : > { %v4444_v19 = vld [vmem:[%s5290_s24 + $0xc4] ss:$8 sps:$4 sm:$0xff]   ;;  %v4446_v20 = vld [vmem:[%s5290_s24 + $0x40] ss:$8 sps:$4 sm:$0xff]   ;;  %v4448_v22 = vld [vmem:[%s5290_s24 + $0x54] ss:$8 sps:$4 sm:$0xff]  }
 0x3c0   : > { %1513 = vmatpush1.bf16.msra.mxu0 %v4428_v7  ;;  %1634 = vmatpush1.bf16.msra.mxu1 %v4429_v8  ;;  %v4447_v21 = vld [vmem:[%s5290_s24 + $0xc0] ss:$8 sps:$4 sm:$0xff]   ;;  %v4450_v23 = vld [vmem:[%s5290_s24 + $0xd4] ss:$8 sps:$4 sm:$0xff]   ;;  %v4452_v24 = vld [vmem:[%s5290_s24 + $0x50] ss:$8 sps:$4 sm:$0xff]  }
 0x3c1   : > { %1514 = vmatprep.subr.bf16.mxu0 %v4430_v9  ;;  %1635 = vmatprep.subr.bf16.mxu1 %v4432_v10  ;;  %v4453_v25 = vld [vmem:[%s5290_s24 + $0xd0] ss:$8 sps:$4 sm:$0xff]   ;;  %v4454_v16 = vld [vmem:[%s5290_s24 + $0x64] ss:$8 sps:$4 sm:$0xff]   ;;  %v4458_v27 = vld [vmem:[%s5290_s24 + $0x60] ss:$8 sps:$4 sm:$0xff]  }
 0x3c2   : > { %v4456_v26 = vld [vmem:[%s5290_s24 + $0xe4] ss:$8 sps:$4 sm:$0xff]   ;;  %v4459_v28 = vld [vmem:[%s5290_s24 + $0xe0] ss:$8 sps:$4 sm:$0xff]   ;;  %v4460_v29 = vld [vmem:[%s5290_s24 + $0x74] ss:$8 sps:$4 sm:$0xff]  }
 0x3c3   : > { %v4462_v30 = vld [vmem:[%s5290_s24 + $0xf4] ss:$8 sps:$4 sm:$0xff]   ;;  %v4464_v31 = vld [vmem:[%s5290_s24 + $0x70] ss:$8 sps:$4 sm:$0xff]   ;;  %v4468_v35 = vld [vmem:[%s5290_s24 + $0x104] ss:$8 sps:$4 sm:$0xff]  }
 0x3c4   : > { %1515 = vmatpush1.bf16.msra.mxu0 %v4434_v11  ;;  %1636 = vmatpush1.bf16.msra.mxu1 %v4435_v12  ;;  %v4465_v32 = vld [vmem:[%s5290_s24 + $0xf0] ss:$8 sps:$4 sm:$0xff]   ;;  %v1142_v33 = vld [vmem:[#allocation2] sm:$0x3]  ;;  %v4471_v36 = vld [vmem:[%s5290_s24 + $0x184] ss:$8 sps:$4 sm:$0xff]  }
 0x3c5   : > { %1516 = vmatprep.subr.bf16.mxu0 %v4436_v13  ;;  %1637 = vmatprep.subr.bf16.mxu1 %v4438_v14  ;;  %v1143_v34 = vld [vmem:[#allocation2 + $0x2] sm:$0x3]  ;;  %v1158_v37 = vpack.c.bf16 %v1142_v33, %v1142_v33  ;;  %v4466_v39 = vld [vmem:[%s5290_s24 + $0x100] ss:$8 sps:$4 sm:$0xff]   ;;  %v4474_v41 = vld [vmem:[%s5290_s24 + $0x114] ss:$8 sps:$4 sm:$0xff]  }
 0x3c6   : > { %v1159_v38 = vpack.c.bf16 %v1143_v34, %v1143_v34  ;;  %v4469_v40 = vld [vmem:[%s5290_s24 + $0x180] ss:$8 sps:$4 sm:$0xff]   ;;  %v4477_v42 = vld [vmem:[%s5290_s24 + $0x194] ss:$8 sps:$4 sm:$0xff]   ;;  %v4472_v43 = vld [vmem:[%s5290_s24 + $0x110] ss:$8 sps:$4 sm:$0xff]  }
 0x3c7   : > { %v4475_v44 = vld [vmem:[%s5290_s24 + $0x190] ss:$8 sps:$4 sm:$0xff]   ;;  %v4480_v45 = vld [vmem:[%s5290_s24 + $0x124] ss:$8 sps:$4 sm:$0xff]   ;;  %v4478_v47 = vld [vmem:[%s5290_s24 + $0x120] ss:$8 sps:$4 sm:$0xff]  }
 0x3c8   : > { %1517 = vmatpush1.bf16.msra.mxu0 %v4440_v15  ;;  %1638 = vmatpush1.bf16.msra.mxu1 %v4441_v17  ;;  %v4483_v46 = vld [vmem:[%s5290_s24 + $0x1a4] ss:$8 sps:$4 sm:$0xff]   ;;  %v4481_v48 = vld [vmem:[%s5290_s24 + $0x1a0] ss:$8 sps:$4 sm:$0xff]   ;;  %v4486_v49 = vld [vmem:[%s5290_s24 + $0x134] ss:$8 sps:$4 sm:$0xff]  }
 0x3c9   : > { %1518 = vmatprep.subr.bf16.mxu0 %v4442_v18  ;;  %1639 = vmatprep.subr.bf16.mxu1 %v4444_v19  ;;  %v4489_v50 = vld [vmem:[%s5290_s24 + $0x1b4] ss:$8 sps:$4 sm:$0xff]   ;;  %v4484_v51 = vld [vmem:[%s5290_s24 + $0x130] ss:$8 sps:$4 sm:$0xff]   ;;  %v4492_v53 = vld [vmem:[%s5290_s24 + $0x144] ss:$8 sps:$4 sm:$0xff]  }
 0x3ca   : > { %v4487_v52 = vld [vmem:[%s5290_s24 + $0x1b0] ss:$8 sps:$4 sm:$0xff]   ;;  %v4495_v54 = vld [vmem:[%s5290_s24 + $0x1c4] ss:$8 sps:$4 sm:$0xff]   ;;  %v4490_v4 = vld [vmem:[%s5290_s24 + $0x140] ss:$8 sps:$4 sm:$0xff]  }
 0x3cb   : > { %v4493_v55 = vld [vmem:[%s5290_s24 + $0x1c0] ss:$8 sps:$4 sm:$0xff]   ;;  %v4498_v56 = vld [vmem:[%s5290_s24 + $0x154] ss:$8 sps:$4 sm:$0xff]   ;;  %v4496_v58 = vld [vmem:[%s5290_s24 + $0x150] ss:$8 sps:$4 sm:$0xff]  }
 0x3cc   : > { %1519 = vmatpush1.bf16.msra.mxu0 %v4446_v20  ;;  %1640 = vmatpush1.bf16.msra.mxu1 %v4447_v21  ;;  %v4501_v57 = vld [vmem:[%s5290_s24 + $0x1d4] ss:$8 sps:$4 sm:$0xff]   ;;  %v4499_v59 = vld [vmem:[%s5290_s24 + $0x1d0] ss:$8 sps:$4 sm:$0xff]   ;;  %v4504_v60 = vld [vmem:[%s5290_s24 + $0x164] ss:$8 sps:$4 sm:$0xff]  }
 0x3cd   : > { %1520 = vmatprep.subr.bf16.mxu0 %v4448_v22  ;;  %1641 = vmatprep.subr.bf16.mxu1 %v4450_v23  ;;  %v4507_v61 = vld [vmem:[%s5290_s24 + $0x1e4] ss:$8 sps:$4 sm:$0xff]   ;;  %v4502_v63 = vld [vmem:[%s5290_s24 + $0x160] ss:$8 sps:$4 sm:$0xff]   ;;  %v4510_v0 = vld [vmem:[%s5290_s24 + $0x174] ss:$8 sps:$4 sm:$0xff]  }
 0x3ce   : > { %v4505_v62 = vld [vmem:[%s5290_s24 + $0x1e0] ss:$8 sps:$4 sm:$0xff]   ;;  %v4513_v2 = vld [vmem:[%s5290_s24 + $0x1f4] ss:$8 sps:$4 sm:$0xff]   ;;  %v4508_v3 = vld [vmem:[%s5290_s24 + $0x170] ss:$8 sps:$4 sm:$0xff]  }
 0x3cf   : > { %v4511_v5 = vld [vmem:[%s5290_s24 + $0x1f0] ss:$8 sps:$4 sm:$0xff]   ;;  %v1145_v7 = vld [vmem:[#allocation2 + $0x6] sm:$0x3]  ;;  %v4516_v8 = vld [vmem:[%s5290_s24 + $0x204] ss:$8 sps:$4 sm:$0xff]  }
 0x3d0   : > { %1521 = vmatpush1.bf16.msra.mxu0 %v4452_v24  ;;  %1642 = vmatpush1.bf16.msra.mxu1 %v4453_v25  ;;  %v1144_v6 = vld [vmem:[#allocation2 + $0x4] sm:$0x3]  ;;  %v4519_v9 = vld [vmem:[%s5290_s24 + $0x284] ss:$8 sps:$4 sm:$0xff]   ;;  %v1161_v11 = vpack.c.bf16 %v1145_v7, %v1145_v7  ;;  %v4514_v12 = vld [vmem:[%s5290_s24 + $0x200] ss:$8 sps:$4 sm:$0xff]  }
 0x3d1   : > { %1522 = vmatprep.subr.bf16.mxu0 %v4454_v16  ;;  %1643 = vmatprep.subr.bf16.mxu1 %v4456_v26  ;;  %v1160_v10 = vpack.c.bf16 %v1144_v6, %v1144_v6  ;;  %v4517_v13 = vld [vmem:[%s5290_s24 + $0x280] ss:$8 sps:$4 sm:$0xff]   ;;  %v4522_v14 = vld [vmem:[%s5290_s24 + $0x214] ss:$8 sps:$4 sm:$0xff]   ;;  %v4520_v17 = vld [vmem:[%s5290_s24 + $0x210] ss:$8 sps:$4 sm:$0xff]  }
 0x3d2   : > { %v4525_v15 = vld [vmem:[%s5290_s24 + $0x294] ss:$8 sps:$4 sm:$0xff]   ;;  %v4523_v18 = vld [vmem:[%s5290_s24 + $0x290] ss:$8 sps:$4 sm:$0xff]   ;;  %v4528_v19 = vld [vmem:[%s5290_s24 + $0x224] ss:$8 sps:$4 sm:$0xff]  }
 0x3d3   : > { %v4531_v20 = vld [vmem:[%s5290_s24 + $0x2a4] ss:$8 sps:$4 sm:$0xff]   ;;  %v4526_v21 = vld [vmem:[%s5290_s24 + $0x220] ss:$8 sps:$4 sm:$0xff]   ;;  %v4534_v23 = vld [vmem:[%s5290_s24 + $0x234] ss:$8 sps:$4 sm:$0xff]  }
 0x3d4   : > { %1523 = vmatpush1.bf16.msra.mxu0 %v4458_v27  ;;  %1644 = vmatpush1.bf16.msra.mxu1 %v4459_v28  ;;  %v4529_v22 = vld [vmem:[%s5290_s24 + $0x2a0] ss:$8 sps:$4 sm:$0xff]   ;;  %v4537_v24 = vld [vmem:[%s5290_s24 + $0x2b4] ss:$8 sps:$4 sm:$0xff]   ;;  %v4532_v25 = vld [vmem:[%s5290_s24 + $0x230] ss:$8 sps:$4 sm:$0xff]  }
 0x3d5   : > { %1524 = vmatprep.subr.bf16.mxu0 %v4460_v29  ;;  %1645 = vmatprep.subr.bf16.mxu1 %v4462_v30  ;;  %v4535_v16 = vld [vmem:[%s5290_s24 + $0x2b0] ss:$8 sps:$4 sm:$0xff]   ;;  %v4540_v26 = vld [vmem:[%s5290_s24 + $0x244] ss:$8 sps:$4 sm:$0xff]   ;;  %v4538_v28 = vld [vmem:[%s5290_s24 + $0x240] ss:$8 sps:$4 sm:$0xff]  }
 0x3d6   : > { %v4543_v27 = vld [vmem:[%s5290_s24 + $0x2c4] ss:$8 sps:$4 sm:$0xff]   ;;  %v4541_v29 = vld [vmem:[%s5290_s24 + $0x2c0] ss:$8 sps:$4 sm:$0xff]   ;;  %v4546_v30 = vld [vmem:[%s5290_s24 + $0x254] ss:$8 sps:$4 sm:$0xff]  }
 0x3d7   : > { %v4547_v33 = vld [vmem:[%s5290_s24 + $0x2d0] ss:$8 sps:$4 sm:$0xff]   ;;  %v4552_v34 = vld [vmem:[%s5290_s24 + $0x264] ss:$8 sps:$4 sm:$0xff]   ;;  %p4094_p3 = scmp.ne.s32.totalorder %s5097_s25, 3 }
 0x3d8   : > { %1525 = vmatpush1.bf16.msra.mxu0 %v4464_v31  ;;  %1646 = vmatpush1.bf16.msra.mxu1 %v4465_v32  ;;  %v4549_v31 = vld [vmem:[%s5290_s24 + $0x2d4] ss:$8 sps:$4 sm:$0xff]   ;;  %v4544_v32 = vld [vmem:[%s5290_s24 + $0x250] ss:$8 sps:$4 sm:$0xff]   ;;  %v4600_v7 = vld [vmem:[%s5290_s24 + $0x364] ss:$8 sps:$4 sm:$0xff]  }
 0x3d9   : > { %1752 = vmatprep.subr.bf16.mxu0 %v4468_v35  ;;  %1873 = vmatprep.subr.bf16.mxu1 %v4471_v36  ;;  %v4555_v35 = vld [vmem:[%s5290_s24 + $0x2e4] ss:$8 sps:$4 sm:$0xff]   ;;  %v4550_v36 = vld [vmem:[%s5290_s24 + $0x260] ss:$8 sps:$4 sm:$0xff]   ;;  %v4595_v6 = vld [vmem:[%s5290_s24 + $0x3d0] ss:$8 sps:$4 sm:$0xff]  }
 0x3db   : > { %1543 = vmatmul.mubr.bf16.vlgmr.msra.gmra.mrb[0].mxu0 %v1158_v37  ;;  %1664 = vmatmul.mubr.bf16.vlgmr.msra.gmra.mrb[0].mxu1 %v1159_v38  ;;  %v4553_v37 = vld [vmem:[%s5290_s24 + $0x2e0] ss:$8 sps:$4 sm:$0xff]   ;;  %v4558_v38 = vld [vmem:[%s5290_s24 + $0x274] ss:$8 sps:$4 sm:$0xff]  }
 0x3dc   : > { %1753 = vmatpush1.bf16.msra.mxu0 %v4466_v39  ;;  %1874 = vmatpush1.bf16.msra.mxu1 %v4469_v40  ;;  %v4561_v39 = vld [vmem:[%s5290_s24 + $0x2f4] ss:$8 sps:$4 sm:$0xff]   ;;  %v4556_v40 = vld [vmem:[%s5290_s24 + $0x270] ss:$8 sps:$4 sm:$0xff]  }
 0x3dd   : > { %1754 = vmatprep.subr.bf16.mxu0 %v4474_v41  ;;  %1875 = vmatprep.subr.bf16.mxu1 %v4477_v42  ;;  %v4559_v41 = vld [vmem:[%s5290_s24 + $0x2f0] ss:$8 sps:$4 sm:$0xff]   ;;  %v1146_v42 = vld [vmem:[#allocation2 + $0x8] sm:$0x3] }
 0x3de   : > { %1784 = vmatprep.mubr.bf16.mxu0 %v5039_v1  ;;  %1905 = vmatprep.mubr.bf16.mxu1 %v5039_v1 }
 0x3e0   : > { %1755 = vmatpush1.bf16.msra.mxu0 %v4472_v43  ;;  %1876 = vmatpush1.bf16.msra.mxu1 %v4475_v44  ;;  %v1147_v43 = vld [vmem:[#allocation2 + $0xa] sm:$0x3]  ;;  %v4564_v44 = vld [vmem:[%s5290_s24 + $0x304] ss:$8 sps:$4 sm:$0xff]  }
 0x3e1   : > { %1756 = vmatprep.subr.bf16.mxu0 %v4480_v45  ;;  %1877 = vmatprep.subr.bf16.mxu1 %v4483_v46  ;;  %v4567_v45 = vld [vmem:[%s5290_s24 + $0x384] ss:$8 sps:$4 sm:$0xff]   ;;  %v1162_v46 = vpack.c.bf16 %v1146_v42, %v1146_v42  ;;  %v4643_v42 = vld [vmem:[%s5290_s24 + $0x4d0] ss:$8 sps:$4 sm:$0xff]  }
 0x3e4   : > { %1757 = vmatpush1.bf16.msra.mxu0 %v4478_v47  ;;  %1878 = vmatpush1.bf16.msra.mxu1 %v4481_v48  ;;  %v1163_v47 = vpack.c.bf16 %v1147_v43, %v1147_v43  ;;  %v4562_v48 = vld [vmem:[%s5290_s24 + $0x300] ss:$8 sps:$4 sm:$0xff]   ;;  %v4648_v43 = vld [vmem:[%s5290_s24 + $0x464] ss:$8 sps:$4 sm:$0xff]  }
 0x3e5   : > { %1758 = vmatprep.subr.bf16.mxu0 %v4486_v49  ;;  %1879 = vmatprep.subr.bf16.mxu1 %v4489_v50  ;;  %v4565_v49 = vld [vmem:[%s5290_s24 + $0x380] ss:$8 sps:$4 sm:$0xff]   ;;  %v4570_v50 = vld [vmem:[%s5290_s24 + $0x314] ss:$8 sps:$4 sm:$0xff]  }
 0x3e8   : > { %1759 = vmatpush1.bf16.msra.mxu0 %v4484_v51  ;;  %1880 = vmatpush1.bf16.msra.mxu1 %v4487_v52  ;;  %v4573_v51 = vld [vmem:[%s5290_s24 + $0x394] ss:$8 sps:$4 sm:$0xff]   ;;  %v4568_v52 = vld [vmem:[%s5290_s24 + $0x310] ss:$8 sps:$4 sm:$0xff]  }
 0x3e9   : > { %1760 = vmatprep.subr.bf16.mxu0 %v4492_v53  ;;  %1881 = vmatprep.subr.bf16.mxu1 %v4495_v54  ;;  %v4571_v53 = vld [vmem:[%s5290_s24 + $0x390] ss:$8 sps:$4 sm:$0xff]   ;;  %v4576_v54 = vld [vmem:[%s5290_s24 + $0x324] ss:$8 sps:$4 sm:$0xff]  }
 0x3ec   : > { %1761 = vmatpush1.bf16.msra.mxu0 %v4490_v4  ;;  %1882 = vmatpush1.bf16.msra.mxu1 %v4493_v55  ;;  %v4579_v4 = vld [vmem:[%s5290_s24 + $0x3a4] ss:$8 sps:$4 sm:$0xff]   ;;  %v4574_v55 = vld [vmem:[%s5290_s24 + $0x320] ss:$8 sps:$4 sm:$0xff]  }
 0x3ed   : > { %1762 = vmatprep.subr.bf16.mxu0 %v4498_v56  ;;  %1883 = vmatprep.subr.bf16.mxu1 %v4501_v57  ;;  %v4577_v56 = vld [vmem:[%s5290_s24 + $0x3a0] ss:$8 sps:$4 sm:$0xff]   ;;  %v4582_v57 = vld [vmem:[%s5290_s24 + $0x334] ss:$8 sps:$4 sm:$0xff]  }
 0x3f0   : > { %1763 = vmatpush1.bf16.msra.mxu0 %v4496_v58  ;;  %1884 = vmatpush1.bf16.msra.mxu1 %v4499_v59  ;;  %v4585_v58 = vld [vmem:[%s5290_s24 + $0x3b4] ss:$8 sps:$4 sm:$0xff]   ;;  %v4580_v59 = vld [vmem:[%s5290_s24 + $0x330] ss:$8 sps:$4 sm:$0xff]  }
 0x3f1   : > { %1764 = vmatprep.subr.bf16.mxu0 %v4504_v60  ;;  %1885 = vmatprep.subr.bf16.mxu1 %v4507_v61  ;;  %v4583_v60 = vld [vmem:[%s5290_s24 + $0x3b0] ss:$8 sps:$4 sm:$0xff]   ;;  %v4588_v61 = vld [vmem:[%s5290_s24 + $0x344] ss:$8 sps:$4 sm:$0xff]  }
 0x3f4   : > { %1765 = vmatpush1.bf16.msra.mxu0 %v4502_v63  ;;  %1886 = vmatpush1.bf16.msra.mxu1 %v4505_v62  ;;  %v4591_v63 = vld [vmem:[%s5290_s24 + $0x3c4] ss:$8 sps:$4 sm:$0xff]   ;;  %v4586_v62 = vld [vmem:[%s5290_s24 + $0x340] ss:$8 sps:$4 sm:$0xff]  }
 0x3f5   : > { %1766 = vmatprep.subr.bf16.mxu0 %v4510_v0  ;;  %1887 = vmatprep.subr.bf16.mxu1 %v4513_v2  ;;  %v4589_v0 = vld [vmem:[%s5290_s24 + $0x3c0] ss:$8 sps:$4 sm:$0xff]   ;;  %v4594_v2 = vld [vmem:[%s5290_s24 + $0x354] ss:$8 sps:$4 sm:$0xff]  }
 0x3f8   : > { %1767 = vmatpush1.bf16.msra.mxu0 %v4508_v3  ;;  %1888 = vmatpush1.bf16.msra.mxu1 %v4511_v5  ;;  %v4597_v3 = vld [vmem:[%s5290_s24 + $0x3d4] ss:$8 sps:$4 sm:$0xff]   ;;  %v4592_v5 = vld [vmem:[%s5290_s24 + $0x350] ss:$8 sps:$4 sm:$0xff]  }
 0x3f9   : > { %1994 = vmatprep.subr.bf16.mxu0 %v4516_v8  ;;  %2115 = vmatprep.subr.bf16.mxu1 %v4519_v9  ;;  %v4603_v8 = vld [vmem:[%s5290_s24 + $0x3e4] ss:$8 sps:$4 sm:$0xff]   ;;  %v4598_v9 = vld [vmem:[%s5290_s24 + $0x360] ss:$8 sps:$4 sm:$0xff]  }
 0x3fb   : > { %1785 = vmatmul.mubr.bf16.vlgmr.msra.gmra.mrb[4].mxu0 %v1160_v10  ;;  %1906 = vmatmul.mubr.bf16.vlgmr.msra.gmra.mrb[4].mxu1 %v1161_v11  ;;  %v4601_v10 = vld [vmem:[%s5290_s24 + $0x3e0] ss:$8 sps:$4 sm:$0xff]   ;;  %v4606_v11 = vld [vmem:[%s5290_s24 + $0x374] ss:$8 sps:$4 sm:$0xff]  }
 0x3fc   : > { %1995 = vmatpush1.bf16.msra.mxu0 %v4514_v12  ;;  %2116 = vmatpush1.bf16.msra.mxu1 %v4517_v13  ;;  %v4609_v12 = vld [vmem:[%s5290_s24 + $0x3f4] ss:$8 sps:$4 sm:$0xff]   ;;  %v4604_v13 = vld [vmem:[%s5290_s24 + $0x370] ss:$8 sps:$4 sm:$0xff]  }
 0x3fd   : > { %1996 = vmatprep.subr.bf16.mxu0 %v4522_v14  ;;  %2117 = vmatprep.subr.bf16.mxu1 %v4525_v15  ;;  %v4607_v14 = vld [vmem:[%s5290_s24 + $0x3f0] ss:$8 sps:$4 sm:$0xff]   ;;  %v1148_v15 = vld [vmem:[#allocation2 + $0xc] sm:$0x3] }
 0x3fe   : > { %2026 = vmatprep.mubr.bf16.mxu0 %v5039_v1  ;;  %2147 = vmatprep.mubr.bf16.mxu1 %v5039_v1 }
 0x400   : > { %1997 = vmatpush1.bf16.msra.mxu0 %v4520_v17  ;;  %2118 = vmatpush1.bf16.msra.mxu1 %v4523_v18  ;;  %v1149_v17 = vld [vmem:[#allocation2 + $0xe] sm:$0x3] }
 0x401   : > { %1998 = vmatprep.subr.bf16.mxu0 %v4528_v19  ;;  %2119 = vmatprep.subr.bf16.mxu1 %v4531_v20  ;;  %v4612_v18 = vld [vmem:[%s5290_s24 + $0x404] ss:$8 sps:$4 sm:$0xff]   ;;  %v1164_v20 = vpack.c.bf16 %v1148_v15, %v1148_v15  ;;  %v4691_v15 = vld [vmem:[%s5290_s24 + $0x5d0] ss:$8 sps:$4 sm:$0xff]  }
 0x402   : > { %v4615_v19 = vld [vmem:[%s5290_s24 + $0x484] ss:$8 sps:$4 sm:$0xff]  }
 0x404   : > { %1999 = vmatpush1.bf16.msra.mxu0 %v4526_v21  ;;  %2120 = vmatpush1.bf16.msra.mxu1 %v4529_v22  ;;  %v1165_v21 = vpack.c.bf16 %v1149_v17, %v1149_v17  ;;  %v4610_v22 = vld [vmem:[%s5290_s24 + $0x400] ss:$8 sps:$4 sm:$0xff]   ;;  %v4696_v17 = vld [vmem:[%s5290_s24 + $0x564] ss:$8 sps:$4 sm:$0xff]  }
 0x405   : > { %2000 = vmatprep.subr.bf16.mxu0 %v4534_v23  ;;  %2121 = vmatprep.subr.bf16.mxu1 %v4537_v24  ;;  %v4613_v23 = vld [vmem:[%s5290_s24 + $0x480] ss:$8 sps:$4 sm:$0xff]   ;;  %v4618_v24 = vld [vmem:[%s5290_s24 + $0x414] ss:$8 sps:$4 sm:$0xff]  }
 0x408   : > { %2001 = vmatpush1.bf16.msra.mxu0 %v4532_v25  ;;  %2122 = vmatpush1.bf16.msra.mxu1 %v4535_v16  ;;  %v4621_v25 = vld [vmem:[%s5290_s24 + $0x494] ss:$8 sps:$4 sm:$0xff]   ;;  %v4616_v16 = vld [vmem:[%s5290_s24 + $0x410] ss:$8 sps:$4 sm:$0xff]  }
 0x409   : > { %2002 = vmatprep.subr.bf16.mxu0 %v4540_v26  ;;  %2123 = vmatprep.subr.bf16.mxu1 %v4543_v27  ;;  %v4619_v26 = vld [vmem:[%s5290_s24 + $0x490] ss:$8 sps:$4 sm:$0xff]   ;;  %v4624_v27 = vld [vmem:[%s5290_s24 + $0x424] ss:$8 sps:$4 sm:$0xff]  }
 0x40c   : > { %2003 = vmatpush1.bf16.msra.mxu0 %v4538_v28  ;;  %2124 = vmatpush1.bf16.msra.mxu1 %v4541_v29  ;;  %v4627_v28 = vld [vmem:[%s5290_s24 + $0x4a4] ss:$8 sps:$4 sm:$0xff]   ;;  %v4622_v29 = vld [vmem:[%s5290_s24 + $0x420] ss:$8 sps:$4 sm:$0xff]  }
 0x40d   : > { %2004 = vmatprep.subr.bf16.mxu0 %v4546_v30  ;;  %2125 = vmatprep.subr.bf16.mxu1 %v4549_v31  ;;  %v4625_v30 = vld [vmem:[%s5290_s24 + $0x4a0] ss:$8 sps:$4 sm:$0xff]   ;;  %v4630_v31 = vld [vmem:[%s5290_s24 + $0x434] ss:$8 sps:$4 sm:$0xff]  }
 0x410   : > { %2005 = vmatpush1.bf16.msra.mxu0 %v4544_v32  ;;  %2126 = vmatpush1.bf16.msra.mxu1 %v4547_v33  ;;  %v4633_v32 = vld [vmem:[%s5290_s24 + $0x4b4] ss:$8 sps:$4 sm:$0xff]   ;;  %v4628_v33 = vld [vmem:[%s5290_s24 + $0x430] ss:$8 sps:$4 sm:$0xff]  }
 0x411   : > { %2006 = vmatprep.subr.bf16.mxu0 %v4552_v34  ;;  %2127 = vmatprep.subr.bf16.mxu1 %v4555_v35  ;;  %v4631_v34 = vld [vmem:[%s5290_s24 + $0x4b0] ss:$8 sps:$4 sm:$0xff]   ;;  %v4636_v35 = vld [vmem:[%s5290_s24 + $0x444] ss:$8 sps:$4 sm:$0xff]  }
 0x414   : > { %2007 = vmatpush1.bf16.msra.mxu0 %v4550_v36  ;;  %2128 = vmatpush1.bf16.msra.mxu1 %v4553_v37  ;;  %v4639_v36 = vld [vmem:[%s5290_s24 + $0x4c4] ss:$8 sps:$4 sm:$0xff]   ;;  %v4634_v37 = vld [vmem:[%s5290_s24 + $0x440] ss:$8 sps:$4 sm:$0xff]  }
 0x415   : > { %2008 = vmatprep.subr.bf16.mxu0 %v4558_v38  ;;  %2129 = vmatprep.subr.bf16.mxu1 %v4561_v39  ;;  %v4637_v38 = vld [vmem:[%s5290_s24 + $0x4c0] ss:$8 sps:$4 sm:$0xff]   ;;  %v4642_v39 = vld [vmem:[%s5290_s24 + $0x454] ss:$8 sps:$4 sm:$0xff]  }
 0x418   : > { %2009 = vmatpush1.bf16.msra.mxu0 %v4556_v40  ;;  %2130 = vmatpush1.bf16.msra.mxu1 %v4559_v41  ;;  %v4645_v40 = vld [vmem:[%s5290_s24 + $0x4d4] ss:$8 sps:$4 sm:$0xff]   ;;  %v4640_v41 = vld [vmem:[%s5290_s24 + $0x450] ss:$8 sps:$4 sm:$0xff]  }
 0x419   : > { %2236 = vmatprep.subr.bf16.mxu0 %v4564_v44  ;;  %2357 = vmatprep.subr.bf16.mxu1 %v4567_v45  ;;  %v4651_v44 = vld [vmem:[%s5290_s24 + $0x4e4] ss:$8 sps:$4 sm:$0xff]   ;;  %v4646_v45 = vld [vmem:[%s5290_s24 + $0x460] ss:$8 sps:$4 sm:$0xff]  }
 0x41b   : > { %2027 = vmatmul.mubr.bf16.vlgmr.msra.gmra.mrb[8].mxu0 %v1162_v46  ;;  %2148 = vmatmul.mubr.bf16.vlgmr.msra.gmra.mrb[8].mxu1 %v1163_v47  ;;  %v4649_v46 = vld [vmem:[%s5290_s24 + $0x4e0] ss:$8 sps:$4 sm:$0xff]   ;;  %v4654_v47 = vld [vmem:[%s5290_s24 + $0x474] ss:$8 sps:$4 sm:$0xff]  }
 0x41c   : > { %2237 = vmatpush1.bf16.msra.mxu0 %v4562_v48  ;;  %2358 = vmatpush1.bf16.msra.mxu1 %v4565_v49  ;;  %v4657_v48 = vld [vmem:[%s5290_s24 + $0x4f4] ss:$8 sps:$4 sm:$0xff]   ;;  %v4652_v49 = vld [vmem:[%s5290_s24 + $0x470] ss:$8 sps:$4 sm:$0xff]  }
 0x41d   : > { %2238 = vmatprep.subr.bf16.mxu0 %v4570_v50  ;;  %2359 = vmatprep.subr.bf16.mxu1 %v4573_v51  ;;  %v4655_v50 = vld [vmem:[%s5290_s24 + $0x4f0] ss:$8 sps:$4 sm:$0xff]   ;;  %v1150_v51 = vld [vmem:[#allocation2 + $0x10] sm:$0x3] }
 0x41e   : > { %2268 = vmatprep.mubr.bf16.mxu0 %v5039_v1  ;;  %2389 = vmatprep.mubr.bf16.mxu1 %v5039_v1 }
 0x420   : > { %2239 = vmatpush1.bf16.msra.mxu0 %v4568_v52  ;;  %2360 = vmatpush1.bf16.msra.mxu1 %v4571_v53  ;;  %v1151_v52 = vld [vmem:[#allocation2 + $0x12] sm:$0x3]  ;;  %v4660_v53 = vld [vmem:[%s5290_s24 + $0x504] ss:$8 sps:$4 sm:$0xff]  }
 0x421   : > { %2240 = vmatprep.subr.bf16.mxu0 %v4576_v54  ;;  %2361 = vmatprep.subr.bf16.mxu1 %v4579_v4  ;;  %v4663_v54 = vld [vmem:[%s5290_s24 + $0x584] ss:$8 sps:$4 sm:$0xff]   ;;  %v1166_v4 = vpack.c.bf16 %v1150_v51, %v1150_v51  ;;  %v4739_v51 = vld [vmem:[%s5290_s24 + $0x6d0] ss:$8 sps:$4 sm:$0xff]  }
 0x424   : > { %2241 = vmatpush1.bf16.msra.mxu0 %v4574_v55  ;;  %2362 = vmatpush1.bf16.msra.mxu1 %v4577_v56  ;;  %v1167_v55 = vpack.c.bf16 %v1151_v52, %v1151_v52  ;;  %v4658_v56 = vld [vmem:[%s5290_s24 + $0x500] ss:$8 sps:$4 sm:$0xff]   ;;  %v4744_v52 = vld [vmem:[%s5290_s24 + $0x664] ss:$8 sps:$4 sm:$0xff]  }
 0x425   : > { %2242 = vmatprep.subr.bf16.mxu0 %v4582_v57  ;;  %2363 = vmatprep.subr.bf16.mxu1 %v4585_v58  ;;  %v4661_v57 = vld [vmem:[%s5290_s24 + $0x580] ss:$8 sps:$4 sm:$0xff]   ;;  %v4666_v58 = vld [vmem:[%s5290_s24 + $0x514] ss:$8 sps:$4 sm:$0xff]  }
 0x428   : > { %2243 = vmatpush1.bf16.msra.mxu0 %v4580_v59  ;;  %2364 = vmatpush1.bf16.msra.mxu1 %v4583_v60  ;;  %v4669_v59 = vld [vmem:[%s5290_s24 + $0x594] ss:$8 sps:$4 sm:$0xff]   ;;  %v4664_v60 = vld [vmem:[%s5290_s24 + $0x510] ss:$8 sps:$4 sm:$0xff]  }
 0x429   : > { %2244 = vmatprep.subr.bf16.mxu0 %v4588_v61  ;;  %2365 = vmatprep.subr.bf16.mxu1 %v4591_v63  ;;  %v4667_v61 = vld [vmem:[%s5290_s24 + $0x590] ss:$8 sps:$4 sm:$0xff]   ;;  %v4672_v63 = vld [vmem:[%s5290_s24 + $0x524] ss:$8 sps:$4 sm:$0xff]  }
 0x42c   : > { %2245 = vmatpush1.bf16.msra.mxu0 %v4586_v62  ;;  %2366 = vmatpush1.bf16.msra.mxu1 %v4589_v0  ;;  %v4675_v62 = vld [vmem:[%s5290_s24 + $0x5a4] ss:$8 sps:$4 sm:$0xff]   ;;  %v4670_v0 = vld [vmem:[%s5290_s24 + $0x520] ss:$8 sps:$4 sm:$0xff]  }
 0x42d   : > { %2246 = vmatprep.subr.bf16.mxu0 %v4594_v2  ;;  %2367 = vmatprep.subr.bf16.mxu1 %v4597_v3  ;;  %v4673_v2 = vld [vmem:[%s5290_s24 + $0x5a0] ss:$8 sps:$4 sm:$0xff]   ;;  %v4678_v3 = vld [vmem:[%s5290_s24 + $0x534] ss:$8 sps:$4 sm:$0xff]  }
 0x430   : > { %2247 = vmatpush1.bf16.msra.mxu0 %v4592_v5  ;;  %2368 = vmatpush1.bf16.msra.mxu1 %v4595_v6  ;;  %v4681_v5 = vld [vmem:[%s5290_s24 + $0x5b4] ss:$8 sps:$4 sm:$0xff]   ;;  %v4676_v6 = vld [vmem:[%s5290_s24 + $0x530] ss:$8 sps:$4 sm:$0xff]  }
 0x431   : > { %2248 = vmatprep.subr.bf16.mxu0 %v4600_v7  ;;  %2369 = vmatprep.subr.bf16.mxu1 %v4603_v8  ;;  %v4679_v7 = vld [vmem:[%s5290_s24 + $0x5b0] ss:$8 sps:$4 sm:$0xff]   ;;  %v4684_v8 = vld [vmem:[%s5290_s24 + $0x544] ss:$8 sps:$4 sm:$0xff]  }
 0x434   : > { %2249 = vmatpush1.bf16.msra.mxu0 %v4598_v9  ;;  %2370 = vmatpush1.bf16.msra.mxu1 %v4601_v10  ;;  %v4687_v9 = vld [vmem:[%s5290_s24 + $0x5c4] ss:$8 sps:$4 sm:$0xff]   ;;  %v4682_v10 = vld [vmem:[%s5290_s24 + $0x540] ss:$8 sps:$4 sm:$0xff]  }
 0x435   : > { %2250 = vmatprep.subr.bf16.mxu0 %v4606_v11  ;;  %2371 = vmatprep.subr.bf16.mxu1 %v4609_v12  ;;  %v4685_v11 = vld [vmem:[%s5290_s24 + $0x5c0] ss:$8 sps:$4 sm:$0xff]   ;;  %v4690_v12 = vld [vmem:[%s5290_s24 + $0x554] ss:$8 sps:$4 sm:$0xff]  }
 0x438   : > { %2251 = vmatpush1.bf16.msra.mxu0 %v4604_v13  ;;  %2372 = vmatpush1.bf16.msra.mxu1 %v4607_v14  ;;  %v4693_v13 = vld [vmem:[%s5290_s24 + $0x5d4] ss:$8 sps:$4 sm:$0xff]   ;;  %v4688_v14 = vld [vmem:[%s5290_s24 + $0x550] ss:$8 sps:$4 sm:$0xff]  }
 0x439   : > { %2478 = vmatprep.subr.bf16.mxu0 %v4612_v18  ;;  %2599 = vmatprep.subr.bf16.mxu1 %v4615_v19  ;;  %v4699_v18 = vld [vmem:[%s5290_s24 + $0x5e4] ss:$8 sps:$4 sm:$0xff]   ;;  %v4694_v19 = vld [vmem:[%s5290_s24 + $0x560] ss:$8 sps:$4 sm:$0xff]  }
 0x43b   : > { %2269 = vmatmul.mubr.bf16.vlgmr.msra.gmra.mrb[12].mxu0 %v1164_v20  ;;  %2390 = vmatmul.mubr.bf16.vlgmr.msra.gmra.mrb[12].mxu1 %v1165_v21  ;;  %v4697_v20 = vld [vmem:[%s5290_s24 + $0x5e0] ss:$8 sps:$4 sm:$0xff]   ;;  %v4702_v21 = vld [vmem:[%s5290_s24 + $0x574] ss:$8 sps:$4 sm:$0xff]  }
 0x43c   : > { %2479 = vmatpush1.bf16.msra.mxu0 %v4610_v22  ;;  %2600 = vmatpush1.bf16.msra.mxu1 %v4613_v23  ;;  %v4705_v22 = vld [vmem:[%s5290_s24 + $0x5f4] ss:$8 sps:$4 sm:$0xff]   ;;  %v4700_v23 = vld [vmem:[%s5290_s24 + $0x570] ss:$8 sps:$4 sm:$0xff]  }
 0x43d   : > { %2480 = vmatprep.subr.bf16.mxu0 %v4618_v24  ;;  %2601 = vmatprep.subr.bf16.mxu1 %v4621_v25  ;;  %v4703_v24 = vld [vmem:[%s5290_s24 + $0x5f0] ss:$8 sps:$4 sm:$0xff]   ;;  %v1152_v25 = vld [vmem:[#allocation2 + $0x14] sm:$0x3] }
 0x43e   : > { %2510 = vmatprep.mubr.bf16.mxu0 %v5039_v1  ;;  %2631 = vmatprep.mubr.bf16.mxu1 %v5039_v1 }
 0x440   : > { %2481 = vmatpush1.bf16.msra.mxu0 %v4616_v16  ;;  %2602 = vmatpush1.bf16.msra.mxu1 %v4619_v26  ;;  %v1153_v16 = vld [vmem:[#allocation2 + $0x16] sm:$0x3] }
 0x441   : > { %2482 = vmatprep.subr.bf16.mxu0 %v4624_v27  ;;  %2603 = vmatprep.subr.bf16.mxu1 %v4627_v28  ;;  %v4708_v26 = vld [vmem:[%s5290_s24 + $0x604] ss:$8 sps:$4 sm:$0xff]   ;;  %v1168_v28 = vpack.c.bf16 %v1152_v25, %v1152_v25 }
 0x442   : > { %v4711_v27 = vld [vmem:[%s5290_s24 + $0x684] ss:$8 sps:$4 sm:$0xff]  }
 0x443   : > { %v4792_v25 = vld [vmem:[%s5290_s24 + $0x764] ss:$8 sps:$4 sm:$0xff]  }
 0x444   : > { %2483 = vmatpush1.bf16.msra.mxu0 %v4622_v29  ;;  %2604 = vmatpush1.bf16.msra.mxu1 %v4625_v30  ;;  %v1169_v29 = vpack.c.bf16 %v1153_v16, %v1153_v16  ;;  %v4706_v30 = vld [vmem:[%s5290_s24 + $0x600] ss:$8 sps:$4 sm:$0xff]   ;;  %v4795_v16 = vld [vmem:[%s5290_s24 + $0x7e4] ss:$8 sps:$4 sm:$0xff]  }
 0x445   : > { %2484 = vmatprep.subr.bf16.mxu0 %v4630_v31  ;;  %2605 = vmatprep.subr.bf16.mxu1 %v4633_v32  ;;  %v4709_v31 = vld [vmem:[%s5290_s24 + $0x680] ss:$8 sps:$4 sm:$0xff]   ;;  %v4714_v32 = vld [vmem:[%s5290_s24 + $0x614] ss:$8 sps:$4 sm:$0xff]  }
 0x448   : > { %2485 = vmatpush1.bf16.msra.mxu0 %v4628_v33  ;;  %2606 = vmatpush1.bf16.msra.mxu1 %v4631_v34  ;;  %v4717_v33 = vld [vmem:[%s5290_s24 + $0x694] ss:$8 sps:$4 sm:$0xff]   ;;  %v4712_v34 = vld [vmem:[%s5290_s24 + $0x610] ss:$8 sps:$4 sm:$0xff]  }
 0x449   : > { %2486 = vmatprep.subr.bf16.mxu0 %v4636_v35  ;;  %2607 = vmatprep.subr.bf16.mxu1 %v4639_v36  ;;  %v4715_v35 = vld [vmem:[%s5290_s24 + $0x690] ss:$8 sps:$4 sm:$0xff]   ;;  %v4720_v36 = vld [vmem:[%s5290_s24 + $0x624] ss:$8 sps:$4 sm:$0xff]  }
 0x44c   : > { %2487 = vmatpush1.bf16.msra.mxu0 %v4634_v37  ;;  %2608 = vmatpush1.bf16.msra.mxu1 %v4637_v38  ;;  %v4723_v37 = vld [vmem:[%s5290_s24 + $0x6a4] ss:$8 sps:$4 sm:$0xff]   ;;  %v4718_v38 = vld [vmem:[%s5290_s24 + $0x620] ss:$8 sps:$4 sm:$0xff]  }
 0x44d   : > { %2488 = vmatprep.subr.bf16.mxu0 %v4642_v39  ;;  %2609 = vmatprep.subr.bf16.mxu1 %v4645_v40  ;;  %v4721_v39 = vld [vmem:[%s5290_s24 + $0x6a0] ss:$8 sps:$4 sm:$0xff]   ;;  %v4726_v40 = vld [vmem:[%s5290_s24 + $0x634] ss:$8 sps:$4 sm:$0xff]  }
 0x450   : > { %2489 = vmatpush1.bf16.msra.mxu0 %v4640_v41  ;;  %2610 = vmatpush1.bf16.msra.mxu1 %v4643_v42  ;;  %v4729_v41 = vld [vmem:[%s5290_s24 + $0x6b4] ss:$8 sps:$4 sm:$0xff]   ;;  %v4724_v42 = vld [vmem:[%s5290_s24 + $0x630] ss:$8 sps:$4 sm:$0xff]  }
 0x451   : > { %2490 = vmatprep.subr.bf16.mxu0 %v4648_v43  ;;  %2611 = vmatprep.subr.bf16.mxu1 %v4651_v44  ;;  %v4727_v43 = vld [vmem:[%s5290_s24 + $0x6b0] ss:$8 sps:$4 sm:$0xff]   ;;  %v4732_v44 = vld [vmem:[%s5290_s24 + $0x644] ss:$8 sps:$4 sm:$0xff]  }
 0x454   : > { %2491 = vmatpush1.bf16.msra.mxu0 %v4646_v45  ;;  %2612 = vmatpush1.bf16.msra.mxu1 %v4649_v46  ;;  %v4735_v45 = vld [vmem:[%s5290_s24 + $0x6c4] ss:$8 sps:$4 sm:$0xff]   ;;  %v4730_v46 = vld [vmem:[%s5290_s24 + $0x640] ss:$8 sps:$4 sm:$0xff]  }
 0x455   : > { %2492 = vmatprep.subr.bf16.mxu0 %v4654_v47  ;;  %2613 = vmatprep.subr.bf16.mxu1 %v4657_v48  ;;  %v4733_v47 = vld [vmem:[%s5290_s24 + $0x6c0] ss:$8 sps:$4 sm:$0xff]   ;;  %v4738_v48 = vld [vmem:[%s5290_s24 + $0x654] ss:$8 sps:$4 sm:$0xff]  }
 0x458   : > { %2493 = vmatpush1.bf16.msra.mxu0 %v4652_v49  ;;  %2614 = vmatpush1.bf16.msra.mxu1 %v4655_v50  ;;  %v4741_v49 = vld [vmem:[%s5290_s24 + $0x6d4] ss:$8 sps:$4 sm:$0xff]   ;;  %v4736_v50 = vld [vmem:[%s5290_s24 + $0x650] ss:$8 sps:$4 sm:$0xff]  }
 0x459   : > { %2720 = vmatprep.subr.bf16.mxu0 %v4660_v53  ;;  %2841 = vmatprep.subr.bf16.mxu1 %v4663_v54  ;;  %v4747_v53 = vld [vmem:[%s5290_s24 + $0x6e4] ss:$8 sps:$4 sm:$0xff]   ;;  %v4742_v54 = vld [vmem:[%s5290_s24 + $0x660] ss:$8 sps:$4 sm:$0xff]  }
 0x45b   : > { %2511 = vmatmul.mubr.bf16.vlgmr.msra.gmra.mrb[16].mxu0 %v1166_v4  ;;  %2632 = vmatmul.mubr.bf16.vlgmr.msra.gmra.mrb[16].mxu1 %v1167_v55  ;;  %v4745_v4 = vld [vmem:[%s5290_s24 + $0x6e0] ss:$8 sps:$4 sm:$0xff]   ;;  %v4750_v55 = vld [vmem:[%s5290_s24 + $0x674] ss:$8 sps:$4 sm:$0xff]  }
 0x45c   : > { %2721 = vmatpush1.bf16.msra.mxu0 %v4658_v56  ;;  %2842 = vmatpush1.bf16.msra.mxu1 %v4661_v57  ;;  %v4753_v56 = vld [vmem:[%s5290_s24 + $0x6f4] ss:$8 sps:$4 sm:$0xff]   ;;  %v4748_v57 = vld [vmem:[%s5290_s24 + $0x670] ss:$8 sps:$4 sm:$0xff]  }
 0x45d   : > { %2722 = vmatprep.subr.bf16.mxu0 %v4666_v58  ;;  %2843 = vmatprep.subr.bf16.mxu1 %v4669_v59  ;;  %v4751_v58 = vld [vmem:[%s5290_s24 + $0x6f0] ss:$8 sps:$4 sm:$0xff]   ;;  %v1154_v59 = vld [vmem:[#allocation2 + $0x18] sm:$0x3] }
 0x45e   : > { %2752 = vmatprep.mubr.bf16.mxu0 %v5039_v1  ;;  %2873 = vmatprep.mubr.bf16.mxu1 %v5039_v1 }
 0x460   : > { %2723 = vmatpush1.bf16.msra.mxu0 %v4664_v60  ;;  %2844 = vmatpush1.bf16.msra.mxu1 %v4667_v61  ;;  %v1155_v60 = vld [vmem:[#allocation2 + $0x1a] sm:$0x3]  ;;  %v4756_v61 = vld [vmem:[%s5290_s24 + $0x704] ss:$8 sps:$4 sm:$0xff]  }
 0x461   : > { %2724 = vmatprep.subr.bf16.mxu0 %v4672_v63  ;;  %2845 = vmatprep.subr.bf16.mxu1 %v4675_v62  ;;  %v4759_v63 = vld [vmem:[%s5290_s24 + $0x784] ss:$8 sps:$4 sm:$0xff]   ;;  %v1170_v62 = vpack.c.bf16 %v1154_v59, %v1154_v59 }
 0x464   : > { %2725 = vmatpush1.bf16.msra.mxu0 %v4670_v0  ;;  %2846 = vmatpush1.bf16.msra.mxu1 %v4673_v2  ;;  %v1171_v0 = vpack.c.bf16 %v1155_v60, %v1155_v60  ;;  %v4754_v2 = vld [vmem:[%s5290_s24 + $0x700] ss:$8 sps:$4 sm:$0xff]  }
 0x465   : > { %2726 = vmatprep.subr.bf16.mxu0 %v4678_v3  ;;  %2847 = vmatprep.subr.bf16.mxu1 %v4681_v5  ;;  %v4757_v3 = vld [vmem:[%s5290_s24 + $0x780] ss:$8 sps:$4 sm:$0xff]   ;;  %v4762_v5 = vld [vmem:[%s5290_s24 + $0x714] ss:$8 sps:$4 sm:$0xff]  }
 0x468   : > { %2727 = vmatpush1.bf16.msra.mxu0 %v4676_v6  ;;  %2848 = vmatpush1.bf16.msra.mxu1 %v4679_v7  ;;  %v4765_v6 = vld [vmem:[%s5290_s24 + $0x794] ss:$8 sps:$4 sm:$0xff]   ;;  %v4760_v7 = vld [vmem:[%s5290_s24 + $0x710] ss:$8 sps:$4 sm:$0xff]  }
 0x469   : > { %2728 = vmatprep.subr.bf16.mxu0 %v4684_v8  ;;  %2849 = vmatprep.subr.bf16.mxu1 %v4687_v9  ;;  %v4763_v8 = vld [vmem:[%s5290_s24 + $0x790] ss:$8 sps:$4 sm:$0xff]   ;;  %v4768_v9 = vld [vmem:[%s5290_s24 + $0x724] ss:$8 sps:$4 sm:$0xff]  }
 0x46c   : > { %2729 = vmatpush1.bf16.msra.mxu0 %v4682_v10  ;;  %2850 = vmatpush1.bf16.msra.mxu1 %v4685_v11  ;;  %v4771_v10 = vld [vmem:[%s5290_s24 + $0x7a4] ss:$8 sps:$4 sm:$0xff]   ;;  %v4766_v11 = vld [vmem:[%s5290_s24 + $0x720] ss:$8 sps:$4 sm:$0xff]  }
 0x46d   : > { %2730 = vmatprep.subr.bf16.mxu0 %v4690_v12  ;;  %2851 = vmatprep.subr.bf16.mxu1 %v4693_v13  ;;  %v4769_v12 = vld [vmem:[%s5290_s24 + $0x7a0] ss:$8 sps:$4 sm:$0xff]   ;;  %v4774_v13 = vld [vmem:[%s5290_s24 + $0x734] ss:$8 sps:$4 sm:$0xff]  }
 0x470   : > { %2731 = vmatpush1.bf16.msra.mxu0 %v4688_v14  ;;  %2852 = vmatpush1.bf16.msra.mxu1 %v4691_v15  ;;  %v4777_v14 = vld [vmem:[%s5290_s24 + $0x7b4] ss:$8 sps:$4 sm:$0xff]   ;;  %v4772_v15 = vld [vmem:[%s5290_s24 + $0x730] ss:$8 sps:$4 sm:$0xff]  }
 0x471   : > { %2732 = vmatprep.subr.bf16.mxu0 %v4696_v17  ;;  %2853 = vmatprep.subr.bf16.mxu1 %v4699_v18  ;;  %v4775_v17 = vld [vmem:[%s5290_s24 + $0x7b0] ss:$8 sps:$4 sm:$0xff]   ;;  %v4783_v18 = vld [vmem:[%s5290_s24 + $0x7c4] ss:$8 sps:$4 sm:$0xff]  }
 0x474   : > { %2733 = vmatpush1.bf16.msra.mxu0 %v4694_v19  ;;  %2854 = vmatpush1.bf16.msra.mxu1 %v4697_v20  ;;  %v4778_v19 = vld [vmem:[%s5290_s24 + $0x740] ss:$8 sps:$4 sm:$0xff]  }
 0x475   : > { %2734 = vmatprep.subr.bf16.mxu0 %v4702_v21  ;;  %2855 = vmatprep.subr.bf16.mxu1 %v4705_v22  ;;  %v4781_v20 = vld [vmem:[%s5290_s24 + $0x7c0] ss:$8 sps:$4 sm:$0xff]   ;;  %v4786_v21 = vld [vmem:[%s5290_s24 + $0x754] ss:$8 sps:$4 sm:$0xff]  }
 0x476   : > { %v4789_v22 = vld [vmem:[%s5290_s24 + $0x7d4] ss:$8 sps:$4 sm:$0xff]  }
 0x478   : > { %2735 = vmatpush1.bf16.msra.mxu0 %v4700_v23  ;;  %2856 = vmatpush1.bf16.msra.mxu1 %v4703_v24  ;;  %v4784_v23 = vld [vmem:[%s5290_s24 + $0x750] ss:$8 sps:$4 sm:$0xff]  }
 0x479   : > { %2962 = vmatprep.subr.bf16.mxu0 %v4708_v26  ;;  %3083 = vmatprep.subr.bf16.mxu1 %v4711_v27  ;;  %v4787_v24 = vld [vmem:[%s5290_s24 + $0x7d0] ss:$8 sps:$4 sm:$0xff]  }
 0x47b   : > { %2753 = vmatmul.mubr.bf16.vlgmr.msra.gmra.mrb[20].mxu0 %v1168_v28  ;;  %2874 = vmatmul.mubr.bf16.vlgmr.msra.gmra.mrb[20].mxu1 %v1169_v29 }
 0x47c   : > { %2963 = vmatpush1.bf16.msra.mxu0 %v4706_v30  ;;  %3084 = vmatpush1.bf16.msra.mxu1 %v4709_v31 }
 0x47d   : > { %2964 = vmatprep.subr.bf16.mxu0 %v4714_v32  ;;  %3085 = vmatprep.subr.bf16.mxu1 %v4717_v33  ;;  %v4790_v32 = vld [vmem:[%s5290_s24 + $0x760] ss:$8 sps:$4 sm:$0xff]  }
 0x47e   : > { %2994 = vmatprep.mubr.bf16.mxu0 %v5039_v1  ;;  %3115 = vmatprep.mubr.bf16.mxu1 %v5039_v1 }
 0x480   : > { %2965 = vmatpush1.bf16.msra.mxu0 %v4712_v34  ;;  %3086 = vmatpush1.bf16.msra.mxu1 %v4715_v35 }
 0x481   : > { %2966 = vmatprep.subr.bf16.mxu0 %v4720_v36  ;;  %3087 = vmatprep.subr.bf16.mxu1 %v4723_v37 }
 0x484   : > { %2967 = vmatpush1.bf16.msra.mxu0 %v4718_v38  ;;  %3088 = vmatpush1.bf16.msra.mxu1 %v4721_v39  ;;  %v4793_v38 = vld [vmem:[%s5290_s24 + $0x7e0] ss:$8 sps:$4 sm:$0xff]  }
 0x485   : > { %2968 = vmatprep.subr.bf16.mxu0 %v4726_v40  ;;  %3089 = vmatprep.subr.bf16.mxu1 %v4729_v41 }
 0x488   : > { %2969 = vmatpush1.bf16.msra.mxu0 %v4724_v42  ;;  %3090 = vmatpush1.bf16.msra.mxu1 %v4727_v43  ;;  %v4798_v42 = vld [vmem:[%s5290_s24 + $0x774] ss:$8 sps:$4 sm:$0xff]  }
 0x489   : > { %2970 = vmatprep.subr.bf16.mxu0 %v4732_v44  ;;  %3091 = vmatprep.subr.bf16.mxu1 %v4735_v45  ;;  %v4801_v43 = vld [vmem:[%s5290_s24 + $0x7f4] ss:$8 sps:$4 sm:$0xff]   ;;  %v4796_v44 = vld [vmem:[%s5290_s24 + $0x770] ss:$8 sps:$4 sm:$0xff]  }
 0x48a   : > { %v4799_v45 = vld [vmem:[%s5290_s24 + $0x7f0] ss:$8 sps:$4 sm:$0xff]  }
 0x48c   : > { %2971 = vmatpush1.bf16.msra.mxu0 %v4730_v46  ;;  %3092 = vmatpush1.bf16.msra.mxu1 %v4733_v47  ;;  %v1156_v46 = vld [vmem:[#allocation2 + $0x1c] sm:$0x3]  ;;  %v1157_v47 = vld [vmem:[#allocation2 + $0x1e] sm:$0x3] }
 0x48d   : > { %2972 = vmatprep.subr.bf16.mxu0 %v4738_v48  ;;  %3093 = vmatprep.subr.bf16.mxu1 %v4741_v49  ;;  %v1172_v48 = vpack.c.bf16 %v1156_v46, %v1156_v46  ;;  %v1173_v49 = vpack.c.bf16 %v1157_v47, %v1157_v47 }
 0x490   : > { %2973 = vmatpush1.bf16.msra.mxu0 %v4736_v50  ;;  %3094 = vmatpush1.bf16.msra.mxu1 %v4739_v51 }
 0x491   : > { %2974 = vmatprep.subr.bf16.mxu0 %v4744_v52  ;;  %3095 = vmatprep.subr.bf16.mxu1 %v4747_v53 }
 0x494   : > { %2975 = vmatpush1.bf16.msra.mxu0 %v4742_v54  ;;  %3096 = vmatpush1.bf16.msra.mxu1 %v4745_v4 }
 0x495   : > { %2976 = vmatprep.subr.bf16.mxu0 %v4750_v55  ;;  %3097 = vmatprep.subr.bf16.mxu1 %v4753_v56 }
 0x498   : > { %2977 = vmatpush1.bf16.msra.mxu0 %v4748_v57  ;;  %3098 = vmatpush1.bf16.msra.mxu1 %v4751_v58 }
 0x499   : > { %3204 = vmatprep.subr.bf16.mxu0 %v4756_v61  ;;  %3325 = vmatprep.subr.bf16.mxu1 %v4759_v63 }
 0x49b   : > { %2995 = vmatmul.mubr.bf16.vlgmr.msra.gmra.mrb[24].mxu0 %v1170_v62  ;;  %3116 = vmatmul.mubr.bf16.vlgmr.msra.gmra.mrb[24].mxu1 %v1171_v0 }
 0x49c   : > { %3205 = vmatpush1.bf16.msra.mxu0 %v4754_v2  ;;  %3326 = vmatpush1.bf16.msra.mxu1 %v4757_v3 }
 0x49d   : > { %3206 = vmatprep.subr.bf16.mxu0 %v4762_v5  ;;  %3327 = vmatprep.subr.bf16.mxu1 %v4765_v6 }
 0x49e   : > { %3236 = vmatprep.mubr.bf16.mxu0 %v5039_v1  ;;  %3357 = vmatprep.mubr.bf16.mxu1 %v5039_v1  ;;  %v4780_v1 = vld [vmem:[%s5290_s24 + $0x744] ss:$8 sps:$4 sm:$0xff]   ;;  %s4091_s24 = sshll.u32 %s5097_s25, 8 }
 0x49f   : > { %s3455_s4 = sshra.s32 %s4091_s24, 7 }
 0x4a0   : > { %3207 = vmatpush1.bf16.msra.mxu0 %v4760_v7  ;;  %3328 = vmatpush1.bf16.msra.mxu1 %v4763_v8  ;;  %s4092_s2 = sshll.u32 %s3455_s4, 1 }
 0x4a1   : > { %3208 = vmatprep.subr.bf16.mxu0 %v4768_v9  ;;  %3329 = vmatprep.subr.bf16.mxu1 %v4771_v10 }
 0x4a4   : > { %3209 = vmatpush1.bf16.msra.mxu0 %v4766_v11  ;;  %3330 = vmatpush1.bf16.msra.mxu1 %v4769_v12 }
 0x4a5   : > { %3210 = vmatprep.subr.bf16.mxu0 %v4774_v13  ;;  %3331 = vmatprep.subr.bf16.mxu1 %v4777_v14 }
 0x4a8   : > { %3211 = vmatpush1.bf16.msra.mxu0 %v4772_v15  ;;  %3332 = vmatpush1.bf16.msra.mxu1 %v4775_v17 }
 0x4a9   : > { %3212 = vmatprep.subr.bf16.mxu0 %v4780_v1  ;;  %3333 = vmatprep.subr.bf16.mxu1 %v4783_v18 }
 0x4ac   : > { %3213 = vmatpush1.bf16.msra.mxu0 %v4778_v19  ;;  %3334 = vmatpush1.bf16.msra.mxu1 %v4781_v20 }
 0x4ad   : > { %3214 = vmatprep.subr.bf16.mxu0 %v4786_v21  ;;  %3335 = vmatprep.subr.bf16.mxu1 %v4789_v22 }
 0x4ae   : > { %v1544_v26 = vpop.f32.mrb[0].mxu0  ;;  %v1665_v27 = vpop.f32.mrb[0].mxu1 }
 0x4af   : > { %v3367_v28 = vsel %vm3366_vm4, %v1544_v26, 0.0  ;;  %v3368_v29 = vsel %vm3366_vm4, %v1665_v27, 0.0  ;;  %v1546_v30 = vpop.f32.mrb[1].mxu0  ;;  %v1667_v31 = vpop.f32.mrb[1].mxu1 }
 0x4b0   : > { %v3369_v33 = vadd.f32 %v3368_v29, %v3367_v28  ;;  %v3398_v34 = vsel %vm3366_vm4, %v1546_v30, 0.0  ;;  %v3399_v35 = vsel %vm3366_vm4, %v1667_v31, 0.0  ;;  %v1548_v36 = vpop.f32.mrb[2].mxu0  ;;  %v1669_v37 = vpop.f32.mrb[2].mxu1  ;;  %3215 = vmatpush1.bf16.msra.mxu0 %v4784_v23  ;;  %3336 = vmatpush1.bf16.msra.mxu1 %v4787_v24 }
 0x4b1   : > { %v3400_v39 = vadd.f32 %v3399_v35, %v3398_v34  ;;  %v1549_v40 = vpop.f32.mrb[3].mxu0  ;;  %v1670_v41 = vpop.f32.mrb[3].mxu1  ;;  %3216 = vmatprep.subr.bf16.mxu0 %v4792_v25  ;;  %3337 = vmatprep.subr.bf16.mxu1 %v4795_v16 }
 0x4b4   : > { %3217 = vmatpush1.bf16.msra.mxu0 %v4790_v32  ;;  %3338 = vmatpush1.bf16.msra.mxu1 %v4793_v38 }
 0x4b5   : > { %3218 = vmatprep.subr.bf16.mxu0 %v4798_v42  ;;  %3339 = vmatprep.subr.bf16.mxu1 %v4801_v43 }
 0x4b8   : > { %3219 = vmatpush1.bf16.msra.mxu0 %v4796_v44  ;;  %3340 = vmatpush1.bf16.msra.mxu1 %v4799_v45 }
 0x4bb   : > { %3237 = vmatmul.mubr.bf16.vlgmr.msra.gmra.mrb[28].mxu0 %v1172_v48  ;;  %3358 = vmatmul.mubr.bf16.vlgmr.msra.gmra.mrb[28].mxu1 %v1173_v49 }
 0x4ce   : > { %v1786_v50 = vpop.f32.mrb[4].mxu0  ;;  %v1907_v51 = vpop.f32.mrb[4].mxu1 }
 0x4cf   : > { %v3370_v52 = vsel %vm3366_vm4, %v1786_v50, 0.0  ;;  %v3372_v53 = vsel %vm3366_vm4, %v1907_v51, 0.0  ;;  %v1788_v54 = vpop.f32.mrb[5].mxu0  ;;  %v1909_v4 = vpop.f32.mrb[5].mxu1 }
 0x4d0   : > { %v3371_v55 = vadd.f32 %v3370_v52, %v3369_v33  ;;  %v3401_v56 = vsel %vm3366_vm4, %v1788_v54, 0.0  ;;  %v3403_v57 = vsel %vm3366_vm4, %v1909_v4, 0.0  ;;  %v1790_v58 = vpop.f32.mrb[6].mxu0  ;;  %v1911_v59 = vpop.f32.mrb[6].mxu1 }
 0x4d1   : > { %v3402_v60 = vadd.f32 %v3401_v56, %v3400_v39  ;;  %v1791_v61 = vpop.f32.mrb[7].mxu0  ;;  %v1912_v63 = vpop.f32.mrb[7].mxu1 }
 0x4d2   : > { %v3373_v62 = vadd.f32 %v3372_v53, %v3371_v55 }
 0x4d3   : > { %v3404_v0 = vadd.f32 %v3403_v57, %v3402_v60 }
 0x4ee   : > { %v2028_v2 = vpop.f32.mrb[8].mxu0  ;;  %v2149_v3 = vpop.f32.mrb[8].mxu1 }
 0x4ef   : > { %v3374_v5 = vsel %vm3366_vm4, %v2028_v2, 0.0  ;;  %v3376_v6 = vsel %vm3366_vm4, %v2149_v3, 0.0  ;;  %v2030_v7 = vpop.f32.mrb[9].mxu0  ;;  %v2151_v8 = vpop.f32.mrb[9].mxu1 }
 0x4f0   : > { %v3375_v9 = vadd.f32 %v3374_v5, %v3373_v62  ;;  %v3405_v10 = vsel %vm3366_vm4, %v2030_v7, 0.0  ;;  %v3407_v11 = vsel %vm3366_vm4, %v2151_v8, 0.0  ;;  %v2032_v12 = vpop.f32.mrb[10].mxu0  ;;  %v2153_v13 = vpop.f32.mrb[10].mxu1 }
 0x4f1   : > { %v3406_v14 = vadd.f32 %v3405_v10, %v3404_v0  ;;  %v2033_v15 = vpop.f32.mrb[11].mxu0  ;;  %v2154_v17 = vpop.f32.mrb[11].mxu1 }
 0x4f2   : > { %v3377_v1 = vadd.f32 %v3376_v6, %v3375_v9 }
 0x4f3   : > { %v3408_v18 = vadd.f32 %v3407_v11, %v3406_v14 }
 0x50e   : > { %v2270_v19 = vpop.f32.mrb[12].mxu0  ;;  %v2391_v20 = vpop.f32.mrb[12].mxu1 }
 0x50f   : > { %v3378_v21 = vsel %vm3366_vm4, %v2270_v19, 0.0  ;;  %v3380_v22 = vsel %vm3366_vm4, %v2391_v20, 0.0  ;;  %v2272_v23 = vpop.f32.mrb[13].mxu0  ;;  %v2393_v24 = vpop.f32.mrb[13].mxu1  ;;  %v3431_v19 = vlaneseq }
 0x510   : > { %v3379_v25 = vadd.f32 %v3378_v21, %v3377_v1  ;;  %v3409_v16 = vsel %vm3366_vm4, %v2272_v23, 0.0  ;;  %v3411_v26 = vsel %vm3366_vm4, %v2393_v24, 0.0  ;;  %v2274_v27 = vpop.f32.mrb[14].mxu0  ;;  %v2395_v28 = vpop.f32.mrb[14].mxu1 }
 0x511   : > { %v3410_v29 = vadd.f32 %v3409_v16, %v3408_v18  ;;  %v2275_v30 = vpop.f32.mrb[15].mxu0  ;;  %v2396_v31 = vpop.f32.mrb[15].mxu1  ;;  %v5895_v20 = vshrl.u32 %v3431_v19, 7 }
 0x512   : > { %v3381_v32 = vadd.f32 %v3380_v22, %v3379_v25  ;;  %v3429_v22 = vld [vmem:[%s306_s30] sm:$0x3]  ;;  %s3458_s30 = scalar_lea.vmem [#allocation3], %s4092_s2 }
 0x513   : > { %v3412_v33 = vadd.f32 %v3411_v26, %v3410_v29  ;;  %v3433_v21 = vsub.s32 0, %v5895_v20  ;;  %v3437_v23 = vsub.s32 1, %v5895_v20 }
 0x515   : > { %v3434_v30 = vrot.slane %v3429_v22, %v3433_v21 }
 0x52e   : > { %v2512_v34 = vpop.f32.mrb[16].mxu0  ;;  %v2633_v35 = vpop.f32.mrb[16].mxu1 }
 0x52f   : > { %v3382_v36 = vsel %vm3366_vm4, %v2512_v34, 0.0  ;;  %v3384_v37 = vsel %vm3366_vm4, %v2633_v35, 0.0  ;;  %v2514_v38 = vpop.f32.mrb[17].mxu0  ;;  %v2635_v39 = vpop.f32.mrb[17].mxu1 }
 0x530   : > { %v3383_v40 = vadd.f32 %v3382_v36, %v3381_v32  ;;  %v3413_v41 = vsel %vm3366_vm4, %v2514_v38, 0.0  ;;  %v3415_v42 = vsel %vm3366_vm4, %v2635_v39, 0.0  ;;  %v2516_v43 = vpop.f32.mrb[18].mxu0  ;;  %v2637_v44 = vpop.f32.mrb[18].mxu1  ;;  %v3438_v36 = vrot.slane %v3429_v22, %v3437_v23 }
 0x531   : > { %v3414_v45 = vadd.f32 %v3413_v41, %v3412_v33  ;;  %v2517_v46 = vpop.f32.mrb[19].mxu0  ;;  %v2638_v47 = vpop.f32.mrb[19].mxu1 }
 0x532   : > { %v3385_v48 = vadd.f32 %v3384_v37, %v3383_v40  ;;  %v5040_v46 = vmov (!%p4094_p3), 1983009808  }
 0x533   : > { %v3416_v49 = vadd.f32 %v3415_v42, %v3414_v45  ;;  %v3470_v47 = vunpack.c.l.s4 (!%p4094_p3), %v5040_v46 }
 0x54e   : > { %v2754_v50 = vpop.f32.mrb[20].mxu0  ;;  %v2875_v51 = vpop.f32.mrb[20].mxu1 }
 0x54f   : > { %v3386_v52 = vsel %vm3366_vm4, %v2754_v50, 0.0  ;;  %v3388_v53 = vsel %vm3366_vm4, %v2875_v51, 0.0  ;;  %v2756_v54 = vpop.f32.mrb[21].mxu0  ;;  %v2877_v4 = vpop.f32.mrb[21].mxu1 }
 0x550   : > { %v3387_v55 = vadd.f32 %v3386_v52, %v3385_v48  ;;  %v3417_v56 = vsel %vm3366_vm4, %v2756_v54, 0.0  ;;  %v3419_v57 = vsel %vm3366_vm4, %v2877_v4, 0.0  ;;  %v2758_v58 = vpop.f32.mrb[22].mxu0  ;;  %v2879_v59 = vpop.f32.mrb[22].mxu1 }
 0x551   : > { %v3418_v60 = vadd.f32 %v3417_v56, %v3416_v49  ;;  %v2759_v61 = vpop.f32.mrb[23].mxu0  ;;  %v2880_v63 = vpop.f32.mrb[23].mxu1  ;;  %v3471_v49 = vunpack.c.0.s8 (!%p4094_p3), %v3470_v47 }
 0x552   : > { %v3389_v62 = vadd.f32 %v3388_v53, %v3387_v55 }
 0x553   : > { %v3420_v0 = vadd.f32 %v3419_v57, %v3418_v60  ;;  %v3474_v51 = vsub.s32 (!%p4094_p3), %v3471_v49, %v5895_v20 }
 0x56e   : > { %v2996_v2 = vpop.f32.mrb[24].mxu0  ;;  %v3117_v3 = vpop.f32.mrb[24].mxu1 }
 0x56f   : > { %v3390_v5 = vsel %vm3366_vm4, %v2996_v2, 0.0  ;;  %v3392_v6 = vsel %vm3366_vm4, %v3117_v3, 0.0  ;;  %v2998_v7 = vpop.f32.mrb[25].mxu0  ;;  %v3119_v8 = vpop.f32.mrb[25].mxu1 }
 0x570   : > { %v3391_v9 = vadd.f32 %v3390_v5, %v3389_v62  ;;  %v3421_v10 = vsel %vm3366_vm4, %v2998_v7, 0.0  ;;  %v3423_v11 = vsel %vm3366_vm4, %v3119_v8, 0.0  ;;  %v3000_v12 = vpop.f32.mrb[26].mxu0  ;;  %v3121_v13 = vpop.f32.mrb[26].mxu1 }
 0x571   : > { %v3422_v14 = vadd.f32 %v3421_v10, %v3420_v0  ;;  %v3001_v15 = vpop.f32.mrb[27].mxu0  ;;  %v3122_v17 = vpop.f32.mrb[27].mxu1  ;;  %v5041_v12 = vmov (!%p4094_p3), 269488144  }
 0x572   : > { %v3393_v1 = vadd.f32 %v3392_v6, %v3391_v9  ;;  %v3529_v13 = vunpack.c.l.s4 (!%p4094_p3), %v5041_v12 }
 0x573   : > { %v3424_v18 = vadd.f32 %v3423_v11, %v3422_v14 }
 0x574   : > { %v3530_v14 = vunpack.c.0.s8 (!%p4094_p3), %v3529_v13 }
 0x576   : > { %v3533_v15 = vsub.s32 (!%p4094_p3), %v3530_v14, %v5895_v20 }
 0x58e   : > { %v3238_v24 = vpop.f32.mrb[28].mxu0  ;;  %v3359_v25 = vpop.f32.mrb[28].mxu1 }
 0x58f   : > { %v3394_v16 = vsel %vm3366_vm4, %v3238_v24, 0.0  ;;  %v3396_v26 = vsel %vm3366_vm4, %v3359_v25, 0.0  ;;  %v3240_v27 = vpop.f32.mrb[29].mxu0  ;;  %v3361_v28 = vpop.f32.mrb[29].mxu1 }
 0x590   : > { %v3395_v29 = vadd.f32 %v3394_v16, %v3393_v1  ;;  %v3425_v31 = vsel %vm3366_vm4, %v3240_v27, 0.0  ;;  %v3427_v32 = vsel %vm3366_vm4, %v3361_v28, 0.0  ;;  %v3242_v33 = vpop.f32.mrb[30].mxu0  ;;  %v3363_v34 = vpop.f32.mrb[30].mxu1 }
 0x591   : > { %v3426_v35 = vadd.f32 %v3425_v31, %v3424_v18  ;;  %v3243_v37 = vpop.f32.mrb[31].mxu0  ;;  %v3364_v38 = vpop.f32.mrb[31].mxu1 }
 0x592   : > { %v3397_v39 = vadd.f32 %v3396_v26, %v3395_v29 }
 0x593   : > { %v3428_v40 = vadd.f32 %v3427_v32, %v3426_v35  ;;  %3463 = sbr.rel (%p4094_p3) target bundleno = 1790 (0x6fe), region = 72 }
 0x594   : > { %v3441_v41 = vadd.f32 %v3434_v30, %v3397_v39 }
 0x595   : > { %v3442_v42 = vadd.f32 %v3438_v36, %v3428_v40 }
 0x597   : > { %v3446_v43 = vcombine.low %v3441_v41, %v3442_v42 }
 0x599   : > { %4093 = vst.sshfl [vmem:[%s3458_s30] sm:$0x33 pattern:$0x76325410] %v3446_v43 }
 0x5a0   : > { %v3464_v44 = vld [vmem:[#allocation3] sm:$0xff]  ;;  %v3465_v45 = vld [vmem:[#allocation3 + $0x8] sm:$0xff] }
 0x5a1   : > { %v3468_v48 = vcombine.high %v3464_v44, %v3464_v44  ;;  %v3485_v50 = vcombine.high %v3465_v45, %v3465_v45  ;;  %v3475_v52 = vrot.slane %v3464_v44, %v3474_v51  ;;  %v3492_v54 = vrot.slane %v3465_v45, %v3474_v51 }
 0x5a3   : > { %v3482_v53 = vrot.slane %v3468_v48, %v3474_v51  ;;  %v3499_v4 = vrot.slane %v3485_v50, %v3474_v51  ;;  %v3483_v55 = vcombine.high %v3475_v52, %v3475_v52  ;;  %v3500_v57 = vcombine.high %v3492_v54, %v3492_v54 }
 0x5a4   : > { %v3510_v59 = vsel %vm3366_vm4, %v3475_v52, -inf  ;;  %v3514_v61 = vsel %vm3366_vm4, %v3492_v54, -inf }
 0x5a5   : > { %v3484_v56 = vcombine.high %v3482_v53, %v3482_v53  ;;  %v3501_v58 = vcombine.high %v3499_v4, %v3499_v4  ;;  %v3512_v60 = vsel %vm3366_vm4, %v3482_v53, -inf  ;;  %v3518_v63 = vsel %vm3366_vm4, %v3499_v4, -inf }
 0x5a6   : > { %v3511_v62 = vsel %vm3366_vm4, %v3483_v55, -inf  ;;  %v3515_v2 = vmax.f32 %v3510_v59, %v3514_v61  ;;  %v3516_v3 = vsel %vm3366_vm4, %v3500_v57, -inf  ;;  %v3519_v6 = vmax.f32 %v3512_v60, %v3518_v63 }
 0x5a7   : > { %v3513_v0 = vsel %vm3366_vm4, %v3484_v56, -inf  ;;  %v3517_v5 = vmax.f32 %v3511_v62, %v3516_v3  ;;  %v3520_v7 = vsel %vm3366_vm4, %v3501_v58, -inf }
 0x5a8   : > { %v3521_v8 = vmax.f32 %v3513_v0, %v3520_v7 }
 0x5a9   : > { %v3522_v9 = vmax.f32 %v3515_v2, %v3517_v5 }
 0x5aa   : > { %v3523_v10 = vmax.f32 %v3519_v6, %v3521_v8 }
 0x5ac   : > { %v3524_v11 = vmax.f32 %v3522_v9, %v3523_v10 }
 0x5ae   : > { %3525 = vmax.xlane.f32.xlu0 %v3524_v11 }
 0x63b   : > { %v3526_v17 = vpop.xlane.xlu0 %3525 }
 0x63c   : > { %v3534_v1 = vrot.slane %v3526_v17, %v3533_v15 }
 0x63e   : > { %v3536_v18 = vsub.f32 %v3464_v44, %v3534_v1  ;;  %v3537_v19 = vsub.f32 %v3465_v45, %v3534_v1 }
 0x640   : > { %v3538_v21 = vmul.f32 1.442695, %v3536_v18  ;;  %v3540_v22 = vmul.f32 1.442695, %v3537_v19 }
 0x642   : > { %4804 = vpow2.f32 %v3538_v21 }
 0x643   : > { %4806 = vpow2.f32 %v3540_v22 }
 0x64c   : > { %v4805_v23 = vpop.eup %4804 }
 0x64d   : > { %v4807_v24 = vpop.eup %4806  ;;  %v3544_v25 = vcombine.high %v4805_v23, %v4805_v23  ;;  %v3551_v16 = vrot.slane %v4805_v23, %v3474_v51 }
 0x64e   : > { %v3561_v28 = vcombine.high %v4807_v24, %v4807_v24  ;;  %v3568_v30 = vrot.slane %v4807_v24, %v3474_v51 }
 0x64f   : > { %v3558_v26 = vrot.slane %v3544_v25, %v3474_v51  ;;  %v3559_v27 = vcombine.high %v3551_v16, %v3551_v16  ;;  %v3586_v31 = vsel %vm3366_vm4, %v3551_v16, 0.0 }
 0x650   : > { %v3575_v35 = vrot.slane %v3561_v28, %v3474_v51  ;;  %v3576_v36 = vcombine.high %v3568_v30, %v3568_v30  ;;  %v3593_v39 = vsel %vm3366_vm4, %v3568_v30, 0.0 }
 0x651   : > { %v3560_v29 = vcombine.high %v3558_v26, %v3558_v26  ;;  %v3587_v20 = vsel %vm3366_vm4, %v3559_v27, 0.0  ;;  %v3589_v33 = vsel %vm3366_vm4, %v3558_v26, 0.0 }
 0x652   : > { %v3588_v32 = vadd.f32 %v3587_v20, %v3586_v31  ;;  %v3577_v41 = vcombine.high %v3575_v35, %v3575_v35  ;;  %v3595_v42 = vsel %vm3366_vm4, %v3576_v36, 0.0  ;;  %v3597_v44 = vsel %vm3366_vm4, %v3575_v35, 0.0 }
 0x653   : > { %v3591_v37 = vsel %vm3366_vm4, %v3560_v29, 0.0 }
 0x654   : > { %v3590_v34 = vadd.f32 %v3589_v33, %v3588_v32  ;;  %v3599_v46 = vsel %vm3366_vm4, %v3577_v41, 0.0 }
 0x656   : > { %v3592_v38 = vadd.f32 %v3591_v37, %v3590_v34 }
 0x658   : > { %v3594_v40 = vadd.f32 %v3593_v39, %v3592_v38 }
 0x65a   : > { %v3596_v43 = vadd.f32 %v3595_v42, %v3594_v40 }
 0x65c   : > { %v3598_v45 = vadd.f32 %v3597_v44, %v3596_v43 }
 0x65e   : > { %v3600_v47 = vadd.f32 %v3599_v46, %v3598_v45 }
 0x660   : > { %3601 = vadd.xlane.f32.xlu0 %v3600_v47 }
 0x6ed   : > { %v3602_v48 = vpop.xlane.xlu0 %3601 }
 0x6ee   : > { %4808 = vrcp.f32 %v3602_v48 }
 0x6f8   : > { %v4809_v49 = vpop.eup %4808 }
 0x6f9   : > { %v3612_v50 = vrot.slane %v4809_v49, %v3533_v15 }
 0x6fb   : > { %v3614_v51 = vmul.f32 %v4805_v23, %v3612_v50  ;;  %v3615_v52 = vmul.f32 %v4807_v24, %v3612_v50 }
 0x6fd   : > { %3616 = vst [vmem:[#allocation13] sm:$0xff] %v3614_v51  ;;  %3617 = vst [vmem:[#allocation13 + $0x8] sm:$0xff] %v3615_v52 }
 0x6fe PF: > { %p4371_p4 = scmp.eq.s32.totalorder %s5097_s25, 3  ;;  %s5042_s13 = smov [#allocation13]  }
 0x6ff   : > { %s3625_s27 = sshll.u32 %s5042_s13, 4  ;;  %s3626_s27 = int_to_ptr.vmem [resolvable:$true] %s3625_s27 }
 0x700   : > { %s4954_s20 = scalar_lea.vmem %s3626_s27, 256  ;;  %p4961_p7 = scmp.lt.s32.totalorder %s3626_s27, %s3626_s27 }
 0x701   : > { %p4955_p2 = scmp.ne.s32.totalorder %s3626_s27, %s4954_s20  ;;  %p4962_p12 = scmp.lt.s32.totalorder %s4954_s20, %s4954_s20 }
 0x703   : > { %p4956_p9 = pnand %p4955_p2, %p4371_p4  ;;  %p4963_p6 = por %p4962_p12, %p4961_p7 }
 0x705   : > { %p4957_p0 = pneg %p4956_p9 }
 0x707   : > { %p4964_p11 = pnand %p4963_p6, %p4957_p0 }
 0x709   : > { %4967 = shalt.err (!%p4964_p11)
}
 0x70a   : > { %s4968_s7 = scalar_lea.hbm %s5967_s6, 256 }
 0x70b   : > { %p4969_p13 = scmp.ne.s32.totalorder %s5967_s6, %s4968_s7  ;;  %p4974_p8 = scmp.lt.u32.totalorder %s4968_s7, %s5967_s6 }
 0x70d   : > { %p4970_p5 = pnand %p4969_p13, %p4371_p4 }
 0x70f   : > { %p4971_p10 = pneg %p4970_p5 }
 0x711   : > { %p4976_p1 = pnand %p4974_p8, %p4971_p10 }
 0x713   : > { %4979 = shalt.err (!%p4976_p1)
}
 0x714   : > { %4344 = dma.vmem_to_hbm [thread:$0]  (%p4371_p4), %s3626_s27, 256, %s5967_s6, [#allocation6]  }
 0x715   : > { %5009 = dma.done.wait (%p4371_p4), [#allocation6], 256  }
 0x716   : > { %5011 = vsyncadd (%p4371_p4), [#allocation6], 4294967040 }
 0x717 PF: > { %s6006_s24 = sld [smem:[#allocation18_spill]]  ;;  %s6007_s10 = sld [smem:[#allocation19_spill]] }
 0x718   : > { %s6008_s21 = smov %s5018_s22  ;;  %s6009_s22 = smov %s5022_s23 }
 0x71d   : > { %p19_p3 = scmp.ge.s32.totalorder %s6006_s24, 6   ;;  %s6010_s23 = smov %s6007_s10 }
 0x71f   :  { %21 = sbr.rel (!%p19_p3) target bundleno = 9 (0x9), region = 115 }
 0x726   :  { %3638 = vsyncpa [#allocation5], 1 }
 0x727   :  { %3640 = vsyncpa [#allocation5 + $0x1], 1 }
 0x728   :  { %3641 = vsyncpa [#allocation8], 1 }
 0x729   :  { %3642 = vsyncpa [#allocation11], 1 }
 0x72a   :  { %3644 = vsyncpa [#allocation11 + $0x1], 1 }
 0x72b   :  { %3645 = vsyncpa [#allocation6], 1 }
 0x72c   :  { %3647 = vsyncpa [#allocation6 + $0x1], 1 }

</bundles_post_ra>
